<compile_context>
chip_gen: v6e
topology: v6e:2x2x1
jax: 0.10.0
libtpu: 0.0.40
codegen_flags: <defaults>
</compile_context>

<pallas_src>
import functools

import jax
import jax.numpy as jnp
from jax.experimental import pallas as pl
from jax.experimental.pallas import tpu as pltpu


# ----------------------------------------------------------------------------- kernel

def _fused_forward_kernel(
        x_ref, mask_ref,
        emb_g_ref, emb_b_ref,
        wqkv_ref, bqkv_ref, wo_ref, bo_ref, ln1g_ref, ln1b_ref,
        w1_ref, b1_ref, w2_ref, b2_ref, ln2g_ref, ln2b_ref,
        pw_ref, pb_ref, cw_ref, cb_ref,
        *rest,
        num_layers, num_heads, head_dim, batch_tile, seq_len, eps, with_loss):
    if with_loss:
        onehot_ref, clw_ref, logits_ref, loss_ref, ctx_ref = rest
    else:
        logits_ref, ctx_ref = rest

    f32, bf16 = jnp.float32, jnp.bfloat16
    S, BT, NH, DH = seq_len, batch_tile, num_heads, head_dim

    x = x_ref[0]                                                 # (BT*S, H) f32
    H = x.shape[-1]

    def layer_norm(v, g, b):
        mu = jnp.mean(v, axis=-1, keepdims=True)
        var = jnp.mean((v - mu) * (v - mu), axis=-1, keepdims=True)
        return (v - mu) * jax.lax.rsqrt(var + eps) * g + b

    # ---- embedding LayerNorm (dropout is identity in eval mode) ----
    x = layer_norm(x, emb_g_ref[...], emb_b_ref[...])

    # ---- additive attention mask built once from the raw 0/1 mask ----
    neg = (1.0 - mask_ref[0]) * (-1e9)                           # (BT, S)

    # ---- encoder layers (statically unrolled; weights resident in VMEM) ----
    for l in range(num_layers):
        xb = x.astype(bf16)
        # fused QKV projection; 1/sqrt(DH) already folded into the Q columns at init
        qkv = jnp.dot(xb, wqkv_ref[l], preferred_element_type=f32) + bqkv_ref[l]  # (BT*S, 3H)
        qkv_b = qkv.astype(bf16)                                 # one wide cast; heads are views

        # per-example, per-head attention via static slices; ctx written into VMEM scratch
        for b in range(BT):
            r0 = b * S
            neg_b = neg[b:b + 1, :]                              # (1, S) broadcasts over queries
            for h in range(NH):
                lo = h * DH
                qh = qkv_b[r0:r0 + S, lo:lo + DH]
                kh = qkv_b[r0:r0 + S, H + lo:H + lo + DH]
                vh = qkv_b[r0:r0 + S, 2 * H + lo:2 * H + lo + DH]
                s = jnp.dot(qh, kh.T, preferred_element_type=f32) + neg_b        # (S, S)
                s = s - jnp.max(s, axis=-1, keepdims=True)
                p = jnp.exp(s)
                p = p * pl.reciprocal(jnp.sum(p, axis=-1, keepdims=True), approx=True)
                ctx_ref[r0:r0 + S, lo:lo + DH] = jnp.dot(
                    p.astype(bf16), vh, preferred_element_type=f32)

        # attention output projection + residual + LayerNorm
        attn = jnp.dot(ctx_ref[...].astype(bf16), wo_ref[l],
                       preferred_element_type=f32) + bo_ref[l]
        y = layer_norm(attn + x, ln1g_ref[l], ln1b_ref[l])

        # FFN (GELU) + residual + LayerNorm
        f = jnp.dot(y.astype(bf16), w1_ref[l], preferred_element_type=f32) + b1_ref[l]
        # TODO(synk): HF BERT uses exact erf-GELU; tanh approximation kept for Mosaic-safe lowering.
        f = 0.5 * f * (1.0 + jnp.tanh(0.7978845608028654 * (f + 0.044715 * f * f * f)))
        f2 = jnp.dot(f.astype(bf16), w2_ref[l], preferred_element_type=f32) + b2_ref[l]
        x = layer_norm(f2 + y, ln2g_ref[l], ln2b_ref[l])

    # ---- pooler(tanh) + classifier on the [CLS] token of each example in the tile ----
    cls = jnp.concatenate([x[b * S:b * S + 1, :] for b in range(BT)], axis=0)     # (BT, H)
    pooled = jnp.tanh(jnp.dot(cls.astype(bf16), pw_ref[...],
                              preferred_element_type=f32) + pb_ref[...])
    logits = jnp.dot(pooled.astype(bf16), cw_ref[...],
                     preferred_element_type=f32) + cb_ref[...]                    # (BT, C)
    logits_ref[0] = logits

    # ---- per-example weighted cross-entropy pieces (final mean taken in the wrapper) ----
    if with_loss:
        z = logits - jnp.max(logits, axis=-1, keepdims=True)
        logp = z - jnp.log(jnp.sum(jnp.exp(z), axis=-1, keepdims=True))
        onehot = onehot_ref[0]                                   # (BT, C)
        w_ex = jnp.sum(onehot * clw_ref[...], axis=-1, keepdims=True)   # (BT, 1)
        nll = -jnp.sum(onehot * logp, axis=-1, keepdims=True)           # (BT, 1)
        loss_ref[0] = jnp.concatenate([w_ex * nll, w_ex], axis=-1)      # (BT, 2)


# ----------------------------------------------------------------------------- wrapper

def _whole(shape):
    return pl.BlockSpec(shape, lambda *_, s=shape: (0,) * len(s))


def pallas_fused_forward(x_emb, attention_mask, params, *, num_heads, batch_tile,
                         onehot=None, class_weights=None, eps=1e-12):
    B, S, H = x_emb.shape
    L = params["wqkv"].shape[0]
    I = params["w1"].shape[2]
    C = params["cls_w"].shape[1]
    assert B % batch_tile == 0, "batch must be divisible by batch_tile"
    T = B // batch_tile
    M = batch_tile * S
    with_loss = onehot is not None

    x_t = x_emb.reshape(T, M, H)
    mask_t = attention_mask.astype(jnp.float32).reshape(T, batch_tile, S)

    in_specs = [
        pl.BlockSpec((1, M, H), lambda t: (t, 0, 0)),            # activations (per batch tile)
        pl.BlockSpec((1, batch_tile, S), lambda t: (t, 0, 0)),   # raw 0/1 attention mask
        _whole((1, H)), _whole((1, H)),                          # embedding LN
        _whole((L, H, 3 * H)), _whole((L, 1, 3 * H)),            # fused QKV (bf16) / bias
        _whole((L, H, H)), _whole((L, 1, H)),                    # attn out proj (bf16) / bias
        _whole((L, 1, H)), _whole((L, 1, H)),                    # LN1
        _whole((L, H, I)), _whole((L, 1, I)),                    # FFN up (bf16) / bias
        _whole((L, I, H)), _whole((L, 1, H)),                    # FFN down (bf16) / bias
        _whole((L, 1, H)), _whole((L, 1, H)),                    # LN2
        _whole((H, H)), _whole((1, H)),                          # pooler (bf16) / bias
        _whole((H, C)), _whole((1, C)),                          # classifier (bf16) / bias
    ]
    args = [x_t, mask_t, params["emb_ln_g"], params["emb_ln_b"],
            params["wqkv"], params["bqkv"], params["wo"], params["bo"],
            params["ln1_g"], params["ln1_b"],
            params["w1"], params["b1"], params["w2"], params["b2"],
            params["ln2_g"], params["ln2_b"],
            params["pool_w"], params["pool_b"], params["cls_w"], params["cls_b"]]

    out_shape = [jax.ShapeDtypeStruct((T, batch_tile, C), jnp.float32)]
    out_specs = [pl.BlockSpec((1, batch_tile, C), lambda t: (t, 0, 0))]
    if with_loss:
        cw = jnp.asarray(class_weights, jnp.float32).reshape(1, C)
        in_specs += [pl.BlockSpec((1, batch_tile, C), lambda t: (t, 0, 0)), _whole((1, C))]
        args += [onehot.reshape(T, batch_tile, C), cw]
        out_shape.append(jax.ShapeDtypeStruct((T, batch_tile, 2), jnp.float32))
        out_specs.append(pl.BlockSpec((1, batch_tile, 2), lambda t: (t, 0, 0)))

    kernel = functools.partial(
        _fused_forward_kernel,
        num_layers=L, num_heads=num_heads, head_dim=H // num_heads,
        batch_tile=batch_tile, seq_len=S, eps=eps, with_loss=with_loss)

    outs = pl.pallas_call(
        kernel,
        out_shape=tuple(out_shape),
        grid=(T,),
        in_specs=in_specs,
        out_specs=tuple(out_specs),
        scratch_shapes=[pltpu.VMEM((M, H), jnp.float32)],        # per-tile attention context slab
        compiler_params=pltpu.CompilerParams(dimension_semantics=("parallel",)),
    )(*args)

    logits = outs[0].reshape(B, C)
    if with_loss:
        pieces = outs[1]                                         # (T, BT, 2) = (w*nll, w)
        loss = jnp.sum(pieces[..., 0]) / jnp.sum(pieces[..., 1])
        return logits, loss
    return logits, None


# ----------------------------------------------------------------------------- model

def init_params(key, vocab, max_pos, hidden, inter, n_layers, n_classes, num_heads):
    def nrm(k, shape):
        return 0.02 * jax.random.normal(k, shape, jnp.float32)

    bf16 = jnp.bfloat16
    scale = 1.0 / ((hidden // num_heads) ** 0.5)        # folded into Q weights (free at init)
    keys = iter(jax.random.split(key, 8 + 8 * n_layers))
    p = {
        "word_emb": nrm(next(keys), (vocab, hidden)),
        "pos_emb": nrm(next(keys), (max_pos, hidden)),
        "type_emb": nrm(next(keys), (2, hidden)),
        "emb_ln_g": jnp.ones((1, hidden), jnp.float32),
        "emb_ln_b": jnp.zeros((1, hidden), jnp.float32),
    }
    stacks = {k: [] for k in ("wqkv", "bqkv", "wo", "bo", "ln1_g", "ln1_b",
                              "w1", "b1", "w2", "b2", "ln2_g", "ln2_b")}
    for _ in range(n_layers):
        wq = nrm(next(keys), (hidden, hidden))
        wk = nrm(next(keys), (hidden, hidden))
        wv = nrm(next(keys), (hidden, hidden))
        stacks["wqkv"].append(jnp.concatenate([wq * scale, wk, wv], axis=1).astype(bf16))
        stacks["bqkv"].append(jnp.zeros((1, 3 * hidden), jnp.float32))
        stacks["wo"].append(nrm(next(keys), (hidden, hidden)).astype(bf16))
        stacks["bo"].append(jnp.zeros((1, hidden), jnp.float32))
        stacks["ln1_g"].append(jnp.ones((1, hidden), jnp.float32))
        stacks["ln1_b"].append(jnp.zeros((1, hidden), jnp.float32))
        stacks["w1"].append(nrm(next(keys), (hidden, inter)).astype(bf16))
        stacks["b1"].append(jnp.zeros((1, inter), jnp.float32))
        stacks["w2"].append(nrm(next(keys), (inter, hidden)).astype(bf16))
        stacks["b2"].append(jnp.zeros((1, hidden), jnp.float32))
        stacks["ln2_g"].append(jnp.ones((1, hidden), jnp.float32))
        stacks["ln2_b"].append(jnp.zeros((1, hidden), jnp.float32))
    for k, v in stacks.items():
        p[k] = jnp.stack(v)                                       # leading layer axis L
    p["pool_w"] = nrm(next(keys), (hidden, hidden)).astype(bf16)
    p["pool_b"] = jnp.zeros((1, hidden), jnp.float32)
    p["cls_w"] = nrm(next(keys), (hidden, n_classes)).astype(bf16)
    p["cls_b"] = jnp.zeros((1, n_classes), jnp.float32)
    return p


def transformer_classifier_forward(params, input_ids, attention_mask, labels=None,
                                   class_weights=None, num_heads=2, batch_tile=1):
    B, S = input_ids.shape
    C = params["cls_w"].shape[1]

    # embeddings (gather stays in plain JAX glue); dropout is identity in eval mode.
    # TODO(synk): token_type_ids assumed all-zero (HF default when not provided).
    x = (params["word_emb"][input_ids]
         + params["pos_emb"][jnp.arange(S)][None, :, :]
         + params["type_emb"][0][None, None, :]).astype(jnp.float32)

    onehot, cw = None, None
    if labels is not None:
        onehot = jax.nn.one_hot(labels, C, dtype=jnp.float32)
        cw = (jnp.ones((1, C), jnp.float32) if class_weights is None
              else jnp.asarray(class_weights, jnp.float32).reshape(1, C))

    return pallas_fused_forward(x, attention_mask, params, num_heads=num_heads,
                                batch_tile=batch_tile, onehot=onehot, class_weights=cw)


# ----------------------------------------------------------------------------- main

if __name__ == "__main__":
    # small bert-tiny-like config: hidden=32, 2 layers, 2 heads, intermediate=64
    B, S = 2, 8
    VOCAB, MAX_POS = 100, 64
    HIDDEN, INTER, LAYERS, HEADS, N_CLASSES = 32, 64, 2, 2, 3    # n_classes must be > 1

    key = jax.random.PRNGKey(0)
    pkey, ikey, lkey = jax.random.split(key, 3)

    params = init_params(pkey, VOCAB, MAX_POS, HIDDEN, INTER, LAYERS, N_CLASSES, HEADS)
    input_ids = jax.random.randint(ikey, (B, S), 0, VOCAB, dtype=jnp.int32)
    attention_mask = jnp.ones((B, S), jnp.int32).at[1, S - 2:].set(0)  # pad last 2 tokens of seq 1
    labels = jax.random.randint(lkey, (B,), 0, N_CLASSES, dtype=jnp.int32)

    # batch_tile: fold the batch into the matmul M dim on single-TC chips (v5e/v6e, M=16,
    # grid=(1,)); keep a parallel per-example batch grid (tile=1 -> grid=(B,)) on dual-TC v7x.
    kind = jax.devices()[0].device_kind.lower()
    batch_tile = 1 if "v7" in kind else (2 if B % 2 == 0 else 1)

    fwd = jax.jit(functools.partial(transformer_classifier_forward,
                                    num_heads=HEADS, batch_tile=batch_tile))
    logits, loss = fwd(params, input_ids, attention_mask, labels)

    jax.block_until_ready((logits, loss))
    assert logits.shape == (B, N_CLASSES)
    assert loss.shape == ()
    print("KERNEL_OK")
</pallas_src>

<mosaic_0001>
module attributes {stable_mosaic.version = 11 : i64} {
  func.func @_fused_forward_kernel(%arg0: i32, %arg1: memref<1x16x32xf32, #tpu.memory_space<vmem>>, %arg2: memref<1x2x8xf32, #tpu.memory_space<vmem>>, %arg3: memref<1x32xf32, #tpu.memory_space<vmem>>, %arg4: memref<1x32xf32, #tpu.memory_space<vmem>>, %arg5: memref<2x32x96xbf16, #tpu.memory_space<vmem>>, %arg6: memref<2x1x96xf32, #tpu.memory_space<vmem>>, %arg7: memref<2x32x32xbf16, #tpu.memory_space<vmem>>, %arg8: memref<2x1x32xf32, #tpu.memory_space<vmem>>, %arg9: memref<2x1x32xf32, #tpu.memory_space<vmem>>, %arg10: memref<2x1x32xf32, #tpu.memory_space<vmem>>, %arg11: memref<2x32x64xbf16, #tpu.memory_space<vmem>>, %arg12: memref<2x1x64xf32, #tpu.memory_space<vmem>>, %arg13: memref<2x64x32xbf16, #tpu.memory_space<vmem>>, %arg14: memref<2x1x32xf32, #tpu.memory_space<vmem>>, %arg15: memref<2x1x32xf32, #tpu.memory_space<vmem>>, %arg16: memref<2x1x32xf32, #tpu.memory_space<vmem>>, %arg17: memref<32x32xbf16, #tpu.memory_space<vmem>>, %arg18: memref<1x32xf32, #tpu.memory_space<vmem>>, %arg19: memref<32x3xbf16, #tpu.memory_space<vmem>>, %arg20: memref<1x3xf32, #tpu.memory_space<vmem>>, %arg21: memref<1x2x3xf32, #tpu.memory_space<vmem>>, %arg22: memref<1x3xf32, #tpu.memory_space<vmem>>, %arg23: memref<1x2x3xf32, #tpu.memory_space<vmem>>, %arg24: memref<1x2x2xf32, #tpu.memory_space<vmem>>, %arg25: memref<16x32xf32, #tpu.memory_space<vmem>>) attributes {dimension_semantics = [#tpu.dimension_semantics<parallel>], iteration_bounds = array<i64: 1>, scalar_prefetch = 0 : i64, scratch_operands = 1 : i64, tpu.core_type = #tpu.core_type<tc>, window_params = [{transform_indices = @transform_0, window_bounds = array<i64: 1, 16, 32>}, {transform_indices = @transform_1, window_bounds = array<i64: 1, 2, 8>}, {pipeline_mode = #tpu.pipeline_mode<synchronous>, transform_indices = @transform_2, window_bounds = array<i64: 1, 32>}, {pipeline_mode = #tpu.pipeline_mode<synchronous>, transform_indices = @transform_3, window_bounds = array<i64: 1, 32>}, {pipeline_mode = #tpu.pipeline_mode<synchronous>, transform_indices = @transform_4, window_bounds = array<i64: 2, 32, 96>}, {pipeline_mode = #tpu.pipeline_mode<synchronous>, transform_indices = @transform_5, window_bounds = array<i64: 2, 1, 96>}, {pipeline_mode = #tpu.pipeline_mode<synchronous>, transform_indices = @transform_6, window_bounds = array<i64: 2, 32, 32>}, {pipeline_mode = #tpu.pipeline_mode<synchronous>, transform_indices = @transform_7, window_bounds = array<i64: 2, 1, 32>}, {pipeline_mode = #tpu.pipeline_mode<synchronous>, transform_indices = @transform_8, window_bounds = array<i64: 2, 1, 32>}, {pipeline_mode = #tpu.pipeline_mode<synchronous>, transform_indices = @transform_9, window_bounds = array<i64: 2, 1, 32>}, {pipeline_mode = #tpu.pipeline_mode<synchronous>, transform_indices = @transform_10, window_bounds = array<i64: 2, 32, 64>}, {pipeline_mode = #tpu.pipeline_mode<synchronous>, transform_indices = @transform_11, window_bounds = array<i64: 2, 1, 64>}, {pipeline_mode = #tpu.pipeline_mode<synchronous>, transform_indices = @transform_12, window_bounds = array<i64: 2, 64, 32>}, {pipeline_mode = #tpu.pipeline_mode<synchronous>, transform_indices = @transform_13, window_bounds = array<i64: 2, 1, 32>}, {pipeline_mode = #tpu.pipeline_mode<synchronous>, transform_indices = @transform_14, window_bounds = array<i64: 2, 1, 32>}, {pipeline_mode = #tpu.pipeline_mode<synchronous>, transform_indices = @transform_15, window_bounds = array<i64: 2, 1, 32>}, {pipeline_mode = #tpu.pipeline_mode<synchronous>, transform_indices = @transform_16, window_bounds = array<i64: 32, 32>}, {pipeline_mode = #tpu.pipeline_mode<synchronous>, transform_indices = @transform_17, window_bounds = array<i64: 1, 32>}, {pipeline_mode = #tpu.pipeline_mode<synchronous>, transform_indices = @transform_18, window_bounds = array<i64: 32, 3>}, {pipeline_mode = #tpu.pipeline_mode<synchronous>, transform_indices = @transform_19, window_bounds = array<i64: 1, 3>}, {transform_indices = @transform_20, window_bounds = array<i64: 1, 2, 3>}, {pipeline_mode = #tpu.pipeline_mode<synchronous>, transform_indices = @transform_21, window_bounds = array<i64: 1, 3>}, {transform_indices = @transform_22, window_bounds = array<i64: 1, 2, 3>}, {transform_indices = @transform_23, window_bounds = array<i64: 1, 2, 2>}]} {
    %c0 = arith.constant 0 : index
    %c0_0 = arith.constant 0 : index
    %c0_1 = arith.constant 0 : index
    %0 = vector.load %arg1[%c0, %c0_0, %c0_1] : memref<1x16x32xf32, #tpu.memory_space<vmem>>, vector<1x16x32xf32>
    %1 = vector.shape_cast %0 : vector<1x16x32xf32> to vector<16x32xf32>
    %c0_2 = arith.constant 0 : index
    %c0_3 = arith.constant 0 : index
    %2 = vector.load %arg3[%c0_2, %c0_3] : memref<1x32xf32, #tpu.memory_space<vmem>>, vector<1x32xf32>
    %c0_4 = arith.constant 0 : index
    %c0_5 = arith.constant 0 : index
    %3 = vector.load %arg4[%c0_4, %c0_5] : memref<1x32xf32, #tpu.memory_space<vmem>>, vector<1x32xf32>
    %cst = arith.constant dense<0.000000e+00> : vector<16xf32>
    %4 = vector.multi_reduction <add>, %1, %cst [1] : vector<16x32xf32> to vector<16xf32>
    %5 = vector.shape_cast %4 : vector<16xf32> to vector<16x1xf32>
    %cst_6 = arith.constant 3.200000e+01 : f32
    %6 = vector.broadcast %cst_6 : f32 to vector<16x1xf32>
    %7 = arith.divf %5, %6 : vector<16x1xf32>
    %8 = vector.broadcast %7 : vector<16x1xf32> to vector<16x32xf32>
    %9 = arith.subf %1, %8 : vector<16x32xf32>
    %10 = vector.broadcast %7 : vector<16x1xf32> to vector<16x32xf32>
    %11 = arith.subf %1, %10 : vector<16x32xf32>
    %12 = arith.mulf %9, %11 : vector<16x32xf32>
    %cst_7 = arith.constant dense<0.000000e+00> : vector<16xf32>
    %13 = vector.multi_reduction <add>, %12, %cst_7 [1] : vector<16x32xf32> to vector<16xf32>
    %14 = vector.shape_cast %13 : vector<16xf32> to vector<16x1xf32>
    %cst_8 = arith.constant 3.200000e+01 : f32
    %15 = vector.broadcast %cst_8 : f32 to vector<16x1xf32>
    %16 = arith.divf %14, %15 : vector<16x1xf32>
    %17 = vector.broadcast %7 : vector<16x1xf32> to vector<16x32xf32>
    %18 = arith.subf %1, %17 : vector<16x32xf32>
    %cst_9 = arith.constant 9.99999996E-13 : f32
    %19 = vector.broadcast %cst_9 : f32 to vector<16x1xf32>
    %20 = arith.addf %16, %19 : vector<16x1xf32>
    %21 = math.rsqrt %20 : vector<16x1xf32>
    %22 = vector.broadcast %21 : vector<16x1xf32> to vector<16x32xf32>
    %23 = arith.mulf %18, %22 : vector<16x32xf32>
    %24 = vector.broadcast %2 : vector<1x32xf32> to vector<16x32xf32>
    %25 = arith.mulf %23, %24 : vector<16x32xf32>
    %26 = vector.broadcast %3 : vector<1x32xf32> to vector<16x32xf32>
    %27 = arith.addf %25, %26 : vector<16x32xf32>
    %c0_10 = arith.constant 0 : index
    %c0_11 = arith.constant 0 : index
    %c0_12 = arith.constant 0 : index
    %28 = vector.load %arg2[%c0_10, %c0_11, %c0_12] : memref<1x2x8xf32, #tpu.memory_space<vmem>>, vector<1x2x8xf32>
    %29 = vector.shape_cast %28 : vector<1x2x8xf32> to vector<2x8xf32>
    %cst_13 = arith.constant 1.000000e+00 : f32
    %30 = vector.broadcast %cst_13 : f32 to vector<2x8xf32>
    %31 = arith.subf %30, %29 : vector<2x8xf32>
    %cst_14 = arith.constant -1.000000e+09 : f32
    %32 = vector.broadcast %cst_14 : f32 to vector<2x8xf32>
    %33 = arith.mulf %31, %32 : vector<2x8xf32>
    %34 = arith.truncf %27 : vector<16x32xf32> to vector<16x32xbf16>
    %c0_15 = arith.constant 0 : index
    %c0_16 = arith.constant 0 : index
    %c0_17 = arith.constant 0 : index
    %35 = vector.load %arg5[%c0_15, %c0_16, %c0_17] : memref<2x32x96xbf16, #tpu.memory_space<vmem>>, vector<1x32x96xbf16>
    %36 = vector.shape_cast %35 : vector<1x32x96xbf16> to vector<32x96xbf16>
    %cst_18 = arith.constant dense<0.000000e+00> : vector<16x96xf32>
    %37 = tpu.matmul %34, %36, %cst_18 {dimension_numbers = #tpu.dot_dimension_numbers<[1], [0], [0], [1], [0, 0, 1, 1], [], []>} : vector<16x32xbf16>, vector<32x96xbf16>, vector<16x96xf32> -> vector<16x96xf32>
    %c0_19 = arith.constant 0 : index
    %c0_20 = arith.constant 0 : index
    %c0_21 = arith.constant 0 : index
    %38 = vector.load %arg6[%c0_19, %c0_20, %c0_21] : memref<2x1x96xf32, #tpu.memory_space<vmem>>, vector<1x1x96xf32>
    %39 = vector.shape_cast %38 : vector<1x1x96xf32> to vector<1x96xf32>
    %40 = vector.broadcast %39 : vector<1x96xf32> to vector<16x96xf32>
    %41 = arith.addf %37, %40 : vector<16x96xf32>
    %42 = arith.truncf %41 : vector<16x96xf32> to vector<16x96xbf16>
    %43 = vector.extract_strided_slice %33 {offsets = [0, 0], sizes = [1, 8], strides = [1, 1]} : vector<2x8xf32> to vector<1x8xf32>
    %44 = vector.extract_strided_slice %42 {offsets = [0, 0], sizes = [8, 16], strides = [1, 1]} : vector<16x96xbf16> to vector<8x16xbf16>
    %45 = vector.extract_strided_slice %42 {offsets = [0, 32], sizes = [8, 16], strides = [1, 1]} : vector<16x96xbf16> to vector<8x16xbf16>
    %46 = vector.extract_strided_slice %42 {offsets = [0, 64], sizes = [8, 16], strides = [1, 1]} : vector<16x96xbf16> to vector<8x16xbf16>
    %47 = tpu.transpose %45, [1, 0] : vector<8x16xbf16> -> vector<16x8xbf16>
    %cst_22 = arith.constant dense<0.000000e+00> : vector<8x8xf32>
    %48 = tpu.matmul %44, %47, %cst_22 {dimension_numbers = #tpu.dot_dimension_numbers<[1], [0], [0], [1], [0, 0, 1, 1], [], []>} : vector<8x16xbf16>, vector<16x8xbf16>, vector<8x8xf32> -> vector<8x8xf32>
    %49 = vector.broadcast %43 : vector<1x8xf32> to vector<8x8xf32>
    %50 = arith.addf %48, %49 : vector<8x8xf32>
    %cst_23 = arith.constant dense<0xFF800000> : vector<8xf32>
    %51 = vector.multi_reduction <maximumf>, %50, %cst_23 [1] : vector<8x8xf32> to vector<8xf32>
    %52 = vector.shape_cast %51 : vector<8xf32> to vector<8x1xf32>
    %53 = vector.broadcast %52 : vector<8x1xf32> to vector<8x8xf32>
    %54 = arith.subf %50, %53 : vector<8x8xf32>
    %55 = math.exp %54 : vector<8x8xf32>
    %cst_24 = arith.constant dense<0.000000e+00> : vector<8xf32>
    %56 = vector.multi_reduction <add>, %55, %cst_24 [1] : vector<8x8xf32> to vector<8xf32>
    %57 = vector.shape_cast %56 : vector<8xf32> to vector<8x1xf32>
    %58 = tpu.reciprocal %57 {approx = true} : vector<8x1xf32> -> vector<8x1xf32>
    %59 = vector.broadcast %58 : vector<8x1xf32> to vector<8x8xf32>
    %60 = arith.mulf %55, %59 : vector<8x8xf32>
    %61 = arith.truncf %60 : vector<8x8xf32> to vector<8x8xbf16>
    %cst_25 = arith.constant dense<0.000000e+00> : vector<8x16xf32>
    %62 = tpu.matmul %61, %46, %cst_25 {dimension_numbers = #tpu.dot_dimension_numbers<[1], [0], [0], [1], [0, 0, 1, 1], [], []>} : vector<8x8xbf16>, vector<8x16xbf16>, vector<8x16xf32> -> vector<8x16xf32>
    %c0_26 = arith.constant 0 : index
    %c0_27 = arith.constant 0 : index
    %63 = vector.load %arg25[%c0_26, %c0_27] : memref<16x32xf32, #tpu.memory_space<vmem>>, vector<8x16xf32>
    tpu.vector_store %arg25[%c0_26, %c0_27], %62 {strides = array<i32>} : memref<16x32xf32, #tpu.memory_space<vmem>>, vector<8x16xf32>,
    %64 = vector.extract_strided_slice %42 {offsets = [0, 16], sizes = [8, 16], strides = [1, 1]} : vector<16x96xbf16> to vector<8x16xbf16>
    %65 = vector.extract_strided_slice %42 {offsets = [0, 48], sizes = [8, 16], strides = [1, 1]} : vector<16x96xbf16> to vector<8x16xbf16>
    %66 = vector.extract_strided_slice %42 {offsets = [0, 80], sizes = [8, 16], strides = [1, 1]} : vector<16x96xbf16> to vector<8x16xbf16>
    %67 = tpu.transpose %65, [1, 0] : vector<8x16xbf16> -> vector<16x8xbf16>
    %cst_28 = arith.constant dense<0.000000e+00> : vector<8x8xf32>
    %68 = tpu.matmul %64, %67, %cst_28 {dimension_numbers = #tpu.dot_dimension_numbers<[1], [0], [0], [1], [0, 0, 1, 1], [], []>} : vector<8x16xbf16>, vector<16x8xbf16>, vector<8x8xf32> -> vector<8x8xf32>
    %69 = vector.broadcast %43 : vector<1x8xf32> to vector<8x8xf32>
    %70 = arith.addf %68, %69 : vector<8x8xf32>
    %cst_29 = arith.constant dense<0xFF800000> : vector<8xf32>
    %71 = vector.multi_reduction <maximumf>, %70, %cst_29 [1] : vector<8x8xf32> to vector<8xf32>
    %72 = vector.shape_cast %71 : vector<8xf32> to vector<8x1xf32>
    %73 = vector.broadcast %72 : vector<8x1xf32> to vector<8x8xf32>
    %74 = arith.subf %70, %73 : vector<8x8xf32>
    %75 = math.exp %74 : vector<8x8xf32>
    %cst_30 = arith.constant dense<0.000000e+00> : vector<8xf32>
    %76 = vector.multi_reduction <add>, %75, %cst_30 [1] : vector<8x8xf32> to vector<8xf32>
    %77 = vector.shape_cast %76 : vector<8xf32> to vector<8x1xf32>
    %78 = tpu.reciprocal %77 {approx = true} : vector<8x1xf32> -> vector<8x1xf32>
    %79 = vector.broadcast %78 : vector<8x1xf32> to vector<8x8xf32>
    %80 = arith.mulf %75, %79 : vector<8x8xf32>
    %81 = arith.truncf %80 : vector<8x8xf32> to vector<8x8xbf16>
    %cst_31 = arith.constant dense<0.000000e+00> : vector<8x16xf32>
    %82 = tpu.matmul %81, %66, %cst_31 {dimension_numbers = #tpu.dot_dimension_numbers<[1], [0], [0], [1], [0, 0, 1, 1], [], []>} : vector<8x8xbf16>, vector<8x16xbf16>, vector<8x16xf32> -> vector<8x16xf32>
    %c0_32 = arith.constant 0 : index
    %c16 = arith.constant 16 : index
    %83 = vector.load %arg25[%c0_32, %c16] : memref<16x32xf32, #tpu.memory_space<vmem>>, vector<8x16xf32>
    tpu.vector_store %arg25[%c0_32, %c16], %82 {strides = array<i32>} : memref<16x32xf32, #tpu.memory_space<vmem>>, vector<8x16xf32>,
    %84 = vector.extract_strided_slice %33 {offsets = [1, 0], sizes = [1, 8], strides = [1, 1]} : vector<2x8xf32> to vector<1x8xf32>
    %85 = vector.extract_strided_slice %42 {offsets = [8, 0], sizes = [8, 16], strides = [1, 1]} : vector<16x96xbf16> to vector<8x16xbf16>
    %86 = vector.extract_strided_slice %42 {offsets = [8, 32], sizes = [8, 16], strides = [1, 1]} : vector<16x96xbf16> to vector<8x16xbf16>
    %87 = vector.extract_strided_slice %42 {offsets = [8, 64], sizes = [8, 16], strides = [1, 1]} : vector<16x96xbf16> to vector<8x16xbf16>
    %88 = tpu.transpose %86, [1, 0] : vector<8x16xbf16> -> vector<16x8xbf16>
    %cst_33 = arith.constant dense<0.000000e+00> : vector<8x8xf32>
    %89 = tpu.matmul %85, %88, %cst_33 {dimension_numbers = #tpu.dot_dimension_numbers<[1], [0], [0], [1], [0, 0, 1, 1], [], []>} : vector<8x16xbf16>, vector<16x8xbf16>, vector<8x8xf32> -> vector<8x8xf32>
    %90 = vector.broadcast %84 : vector<1x8xf32> to vector<8x8xf32>
    %91 = arith.addf %89, %90 : vector<8x8xf32>
    %cst_34 = arith.constant dense<0xFF800000> : vector<8xf32>
    %92 = vector.multi_reduction <maximumf>, %91, %cst_34 [1] : vector<8x8xf32> to vector<8xf32>
    %93 = vector.shape_cast %92 : vector<8xf32> to vector<8x1xf32>
    %94 = vector.broadcast %93 : vector<8x1xf32> to vector<8x8xf32>
    %95 = arith.subf %91, %94 : vector<8x8xf32>
    %96 = math.exp %95 : vector<8x8xf32>
    %cst_35 = arith.constant dense<0.000000e+00> : vector<8xf32>
    %97 = vector.multi_reduction <add>, %96, %cst_35 [1] : vector<8x8xf32> to vector<8xf32>
    %98 = vector.shape_cast %97 : vector<8xf32> to vector<8x1xf32>
    %99 = tpu.reciprocal %98 {approx = true} : vector<8x1xf32> -> vector<8x1xf32>
    %100 = vector.broadcast %99 : vector<8x1xf32> to vector<8x8xf32>
    %101 = arith.mulf %96, %100 : vector<8x8xf32>
    %102 = arith.truncf %101 : vector<8x8xf32> to vector<8x8xbf16>
    %cst_36 = arith.constant dense<0.000000e+00> : vector<8x16xf32>
    %103 = tpu.matmul %102, %87, %cst_36 {dimension_numbers = #tpu.dot_dimension_numbers<[1], [0], [0], [1], [0, 0, 1, 1], [], []>} : vector<8x8xbf16>, vector<8x16xbf16>, vector<8x16xf32> -> vector<8x16xf32>
    %c8 = arith.constant 8 : index
    %c0_37 = arith.constant 0 : index
    %104 = vector.load %arg25[%c8, %c0_37] : memref<16x32xf32, #tpu.memory_space<vmem>>, vector<8x16xf32>
    tpu.vector_store %arg25[%c8, %c0_37], %103 {strides = array<i32>} : memref<16x32xf32, #tpu.memory_space<vmem>>, vector<8x16xf32>,
    %105 = vector.extract_strided_slice %42 {offsets = [8, 16], sizes = [8, 16], strides = [1, 1]} : vector<16x96xbf16> to vector<8x16xbf16>
    %106 = vector.extract_strided_slice %42 {offsets = [8, 48], sizes = [8, 16], strides = [1, 1]} : vector<16x96xbf16> to vector<8x16xbf16>
    %107 = vector.extract_strided_slice %42 {offsets = [8, 80], sizes = [8, 16], strides = [1, 1]} : vector<16x96xbf16> to vector<8x16xbf16>
    %108 = tpu.transpose %106, [1, 0] : vector<8x16xbf16> -> vector<16x8xbf16>
    %cst_38 = arith.constant dense<0.000000e+00> : vector<8x8xf32>
    %109 = tpu.matmul %105, %108, %cst_38 {dimension_numbers = #tpu.dot_dimension_numbers<[1], [0], [0], [1], [0, 0, 1, 1], [], []>} : vector<8x16xbf16>, vector<16x8xbf16>, vector<8x8xf32> -> vector<8x8xf32>
    %110 = vector.broadcast %84 : vector<1x8xf32> to vector<8x8xf32>
    %111 = arith.addf %109, %110 : vector<8x8xf32>
    %cst_39 = arith.constant dense<0xFF800000> : vector<8xf32>
    %112 = vector.multi_reduction <maximumf>, %111, %cst_39 [1] : vector<8x8xf32> to vector<8xf32>
    %113 = vector.shape_cast %112 : vector<8xf32> to vector<8x1xf32>
    %114 = vector.broadcast %113 : vector<8x1xf32> to vector<8x8xf32>
    %115 = arith.subf %111, %114 : vector<8x8xf32>
    %116 = math.exp %115 : vector<8x8xf32>
    %cst_40 = arith.constant dense<0.000000e+00> : vector<8xf32>
    %117 = vector.multi_reduction <add>, %116, %cst_40 [1] : vector<8x8xf32> to vector<8xf32>
    %118 = vector.shape_cast %117 : vector<8xf32> to vector<8x1xf32>
    %119 = tpu.reciprocal %118 {approx = true} : vector<8x1xf32> -> vector<8x1xf32>
    %120 = vector.broadcast %119 : vector<8x1xf32> to vector<8x8xf32>
    %121 = arith.mulf %116, %120 : vector<8x8xf32>
    %122 = arith.truncf %121 : vector<8x8xf32> to vector<8x8xbf16>
    %cst_41 = arith.constant dense<0.000000e+00> : vector<8x16xf32>
    %123 = tpu.matmul %122, %107, %cst_41 {dimension_numbers = #tpu.dot_dimension_numbers<[1], [0], [0], [1], [0, 0, 1, 1], [], []>} : vector<8x8xbf16>, vector<8x16xbf16>, vector<8x16xf32> -> vector<8x16xf32>
    %c8_42 = arith.constant 8 : index
    %c16_43 = arith.constant 16 : index
    %124 = vector.load %arg25[%c8_42, %c16_43] : memref<16x32xf32, #tpu.memory_space<vmem>>, vector<8x16xf32>
    tpu.vector_store %arg25[%c8_42, %c16_43], %123 {strides = array<i32>} : memref<16x32xf32, #tpu.memory_space<vmem>>, vector<8x16xf32>,
    %c0_44 = arith.constant 0 : index
    %c0_45 = arith.constant 0 : index
    %125 = vector.load %arg25[%c0_44, %c0_45] : memref<16x32xf32, #tpu.memory_space<vmem>>, vector<16x32xf32>
    %126 = arith.truncf %125 : vector<16x32xf32> to vector<16x32xbf16>
    %c0_46 = arith.constant 0 : index
    %c0_47 = arith.constant 0 : index
    %c0_48 = arith.constant 0 : index
    %127 = vector.load %arg7[%c0_46, %c0_47, %c0_48] : memref<2x32x32xbf16, #tpu.memory_space<vmem>>, vector<1x32x32xbf16>
    %128 = vector.shape_cast %127 : vector<1x32x32xbf16> to vector<32x32xbf16>
    %cst_49 = arith.constant dense<0.000000e+00> : vector<16x32xf32>
    %129 = tpu.matmul %126, %128, %cst_49 {dimension_numbers = #tpu.dot_dimension_numbers<[1], [0], [0], [1], [0, 0, 1, 1], [], []>} : vector<16x32xbf16>, vector<32x32xbf16>, vector<16x32xf32> -> vector<16x32xf32>
    %c0_50 = arith.constant 0 : index
    %c0_51 = arith.constant 0 : index
    %c0_52 = arith.constant 0 : index
    %130 = vector.load %arg8[%c0_50, %c0_51, %c0_52] : memref<2x1x32xf32, #tpu.memory_space<vmem>>, vector<1x1x32xf32>
    %131 = vector.shape_cast %130 : vector<1x1x32xf32> to vector<1x32xf32>
    %132 = vector.broadcast %131 : vector<1x32xf32> to vector<16x32xf32>
    %133 = arith.addf %129, %132 : vector<16x32xf32>
    %134 = arith.addf %133, %27 : vector<16x32xf32>
    %c0_53 = arith.constant 0 : index
    %c0_54 = arith.constant 0 : index
    %c0_55 = arith.constant 0 : index
    %135 = vector.load %arg9[%c0_53, %c0_54, %c0_55] : memref<2x1x32xf32, #tpu.memory_space<vmem>>, vector<1x1x32xf32>
    %136 = vector.shape_cast %135 : vector<1x1x32xf32> to vector<1x32xf32>
    %c0_56 = arith.constant 0 : index
    %c0_57 = arith.constant 0 : index
    %c0_58 = arith.constant 0 : index
    %137 = vector.load %arg10[%c0_56, %c0_57, %c0_58] : memref<2x1x32xf32, #tpu.memory_space<vmem>>, vector<1x1x32xf32>
    %138 = vector.shape_cast %137 : vector<1x1x32xf32> to vector<1x32xf32>
    %cst_59 = arith.constant dense<0.000000e+00> : vector<16xf32>
    %139 = vector.multi_reduction <add>, %134, %cst_59 [1] : vector<16x32xf32> to vector<16xf32>
    %140 = vector.shape_cast %139 : vector<16xf32> to vector<16x1xf32>
    %cst_60 = arith.constant 3.200000e+01 : f32
    %141 = vector.broadcast %cst_60 : f32 to vector<16x1xf32>
    %142 = arith.divf %140, %141 : vector<16x1xf32>
    %143 = vector.broadcast %142 : vector<16x1xf32> to vector<16x32xf32>
    %144 = arith.subf %134, %143 : vector<16x32xf32>
    %145 = vector.broadcast %142 : vector<16x1xf32> to vector<16x32xf32>
    %146 = arith.subf %134, %145 : vector<16x32xf32>
    %147 = arith.mulf %144, %146 : vector<16x32xf32>
    %cst_61 = arith.constant dense<0.000000e+00> : vector<16xf32>
    %148 = vector.multi_reduction <add>, %147, %cst_61 [1] : vector<16x32xf32> to vector<16xf32>
    %149 = vector.shape_cast %148 : vector<16xf32> to vector<16x1xf32>
    %cst_62 = arith.constant 3.200000e+01 : f32
    %150 = vector.broadcast %cst_62 : f32 to vector<16x1xf32>
    %151 = arith.divf %149, %150 : vector<16x1xf32>
    %152 = vector.broadcast %142 : vector<16x1xf32> to vector<16x32xf32>
    %153 = arith.subf %134, %152 : vector<16x32xf32>
    %cst_63 = arith.constant 9.99999996E-13 : f32
    %154 = vector.broadcast %cst_63 : f32 to vector<16x1xf32>
    %155 = arith.addf %151, %154 : vector<16x1xf32>
    %156 = math.rsqrt %155 : vector<16x1xf32>
    %157 = vector.broadcast %156 : vector<16x1xf32> to vector<16x32xf32>
    %158 = arith.mulf %153, %157 : vector<16x32xf32>
    %159 = vector.broadcast %136 : vector<1x32xf32> to vector<16x32xf32>
    %160 = arith.mulf %158, %159 : vector<16x32xf32>
    %161 = vector.broadcast %138 : vector<1x32xf32> to vector<16x32xf32>
    %162 = arith.addf %160, %161 : vector<16x32xf32>
    %163 = arith.truncf %162 : vector<16x32xf32> to vector<16x32xbf16>
    %c0_64 = arith.constant 0 : index
    %c0_65 = arith.constant 0 : index
    %c0_66 = arith.constant 0 : index
    %164 = vector.load %arg11[%c0_64, %c0_65, %c0_66] : memref<2x32x64xbf16, #tpu.memory_space<vmem>>, vector<1x32x64xbf16>
    %165 = vector.shape_cast %164 : vector<1x32x64xbf16> to vector<32x64xbf16>
    %cst_67 = arith.constant dense<0.000000e+00> : vector<16x64xf32>
    %166 = tpu.matmul %163, %165, %cst_67 {dimension_numbers = #tpu.dot_dimension_numbers<[1], [0], [0], [1], [0, 0, 1, 1], [], []>} : vector<16x32xbf16>, vector<32x64xbf16>, vector<16x64xf32> -> vector<16x64xf32>
    %c0_68 = arith.constant 0 : index
    %c0_69 = arith.constant 0 : index
    %c0_70 = arith.constant 0 : index
    %167 = vector.load %arg12[%c0_68, %c0_69, %c0_70] : memref<2x1x64xf32, #tpu.memory_space<vmem>>, vector<1x1x64xf32>
    %168 = vector.shape_cast %167 : vector<1x1x64xf32> to vector<1x64xf32>
    %169 = vector.broadcast %168 : vector<1x64xf32> to vector<16x64xf32>
    %170 = arith.addf %166, %169 : vector<16x64xf32>
    %cst_71 = arith.constant 5.000000e-01 : f32
    %171 = vector.broadcast %cst_71 : f32 to vector<16x64xf32>
    %172 = arith.mulf %171, %170 : vector<16x64xf32>
    %cst_72 = arith.constant 4.471500e-02 : f32
    %173 = vector.broadcast %cst_72 : f32 to vector<16x64xf32>
    %174 = arith.mulf %173, %170 : vector<16x64xf32>
    %175 = arith.mulf %174, %170 : vector<16x64xf32>
    %176 = arith.mulf %175, %170 : vector<16x64xf32>
    %177 = arith.addf %170, %176 : vector<16x64xf32>
    %cst_73 = arith.constant 0.797884583 : f32
    %178 = vector.broadcast %cst_73 : f32 to vector<16x64xf32>
    %179 = arith.mulf %178, %177 : vector<16x64xf32>
    %180 = math.tanh %179 : vector<16x64xf32>
    %cst_74 = arith.constant 1.000000e+00 : f32
    %181 = vector.broadcast %cst_74 : f32 to vector<16x64xf32>
    %182 = arith.addf %181, %180 : vector<16x64xf32>
    %183 = arith.mulf %172, %182 : vector<16x64xf32>
    %184 = arith.truncf %183 : vector<16x64xf32> to vector<16x64xbf16>
    %c0_75 = arith.constant 0 : index
    %c0_76 = arith.constant 0 : index
    %c0_77 = arith.constant 0 : index
    %185 = vector.load %arg13[%c0_75, %c0_76, %c0_77] : memref<2x64x32xbf16, #tpu.memory_space<vmem>>, vector<1x64x32xbf16>
    %186 = vector.shape_cast %185 : vector<1x64x32xbf16> to vector<64x32xbf16>
    %cst_78 = arith.constant dense<0.000000e+00> : vector<16x32xf32>
    %187 = tpu.matmul %184, %186, %cst_78 {dimension_numbers = #tpu.dot_dimension_numbers<[1], [0], [0], [1], [0, 0, 1, 1], [], []>} : vector<16x64xbf16>, vector<64x32xbf16>, vector<16x32xf32> -> vector<16x32xf32>
    %c0_79 = arith.constant 0 : index
    %c0_80 = arith.constant 0 : index
    %c0_81 = arith.constant 0 : index
    %188 = vector.load %arg14[%c0_79, %c0_80, %c0_81] : memref<2x1x32xf32, #tpu.memory_space<vmem>>, vector<1x1x32xf32>
    %189 = vector.shape_cast %188 : vector<1x1x32xf32> to vector<1x32xf32>
    %190 = vector.broadcast %189 : vector<1x32xf32> to vector<16x32xf32>
    %191 = arith.addf %187, %190 : vector<16x32xf32>
    %192 = arith.addf %191, %162 : vector<16x32xf32>
    %c0_82 = arith.constant 0 : index
    %c0_83 = arith.constant 0 : index
    %c0_84 = arith.constant 0 : index
    %193 = vector.load %arg15[%c0_82, %c0_83, %c0_84] : memref<2x1x32xf32, #tpu.memory_space<vmem>>, vector<1x1x32xf32>
    %194 = vector.shape_cast %193 : vector<1x1x32xf32> to vector<1x32xf32>
    %c0_85 = arith.constant 0 : index
    %c0_86 = arith.constant 0 : index
    %c0_87 = arith.constant 0 : index
    %195 = vector.load %arg16[%c0_85, %c0_86, %c0_87] : memref<2x1x32xf32, #tpu.memory_space<vmem>>, vector<1x1x32xf32>
    %196 = vector.shape_cast %195 : vector<1x1x32xf32> to vector<1x32xf32>
    %cst_88 = arith.constant dense<0.000000e+00> : vector<16xf32>
    %197 = vector.multi_reduction <add>, %192, %cst_88 [1] : vector<16x32xf32> to vector<16xf32>
    %198 = vector.shape_cast %197 : vector<16xf32> to vector<16x1xf32>
    %cst_89 = arith.constant 3.200000e+01 : f32
    %199 = vector.broadcast %cst_89 : f32 to vector<16x1xf32>
    %200 = arith.divf %198, %199 : vector<16x1xf32>
    %201 = vector.broadcast %200 : vector<16x1xf32> to vector<16x32xf32>
    %202 = arith.subf %192, %201 : vector<16x32xf32>
    %203 = vector.broadcast %200 : vector<16x1xf32> to vector<16x32xf32>
    %204 = arith.subf %192, %203 : vector<16x32xf32>
    %205 = arith.mulf %202, %204 : vector<16x32xf32>
    %cst_90 = arith.constant dense<0.000000e+00> : vector<16xf32>
    %206 = vector.multi_reduction <add>, %205, %cst_90 [1] : vector<16x32xf32> to vector<16xf32>
    %207 = vector.shape_cast %206 : vector<16xf32> to vector<16x1xf32>
    %cst_91 = arith.constant 3.200000e+01 : f32
    %208 = vector.broadcast %cst_91 : f32 to vector<16x1xf32>
    %209 = arith.divf %207, %208 : vector<16x1xf32>
    %210 = vector.broadcast %200 : vector<16x1xf32> to vector<16x32xf32>
    %211 = arith.subf %192, %210 : vector<16x32xf32>
    %cst_92 = arith.constant 9.99999996E-13 : f32
    %212 = vector.broadcast %cst_92 : f32 to vector<16x1xf32>
    %213 = arith.addf %209, %212 : vector<16x1xf32>
    %214 = math.rsqrt %213 : vector<16x1xf32>
    %215 = vector.broadcast %214 : vector<16x1xf32> to vector<16x32xf32>
    %216 = arith.mulf %211, %215 : vector<16x32xf32>
    %217 = vector.broadcast %194 : vector<1x32xf32> to vector<16x32xf32>
    %218 = arith.mulf %216, %217 : vector<16x32xf32>
    %219 = vector.broadcast %196 : vector<1x32xf32> to vector<16x32xf32>
    %220 = arith.addf %218, %219 : vector<16x32xf32>
    %221 = arith.truncf %220 : vector<16x32xf32> to vector<16x32xbf16>
    %c1 = arith.constant 1 : index
    %c0_93 = arith.constant 0 : index
    %c0_94 = arith.constant 0 : index
    %222 = vector.load %arg5[%c1, %c0_93, %c0_94] : memref<2x32x96xbf16, #tpu.memory_space<vmem>>, vector<1x32x96xbf16>
    %223 = vector.shape_cast %222 : vector<1x32x96xbf16> to vector<32x96xbf16>
    %cst_95 = arith.constant dense<0.000000e+00> : vector<16x96xf32>
    %224 = tpu.matmul %221, %223, %cst_95 {dimension_numbers = #tpu.dot_dimension_numbers<[1], [0], [0], [1], [0, 0, 1, 1], [], []>} : vector<16x32xbf16>, vector<32x96xbf16>, vector<16x96xf32> -> vector<16x96xf32>
    %c1_96 = arith.constant 1 : index
    %c0_97 = arith.constant 0 : index
    %c0_98 = arith.constant 0 : index
    %225 = vector.load %arg6[%c1_96, %c0_97, %c0_98] : memref<2x1x96xf32, #tpu.memory_space<vmem>>, vector<1x1x96xf32>
    %226 = vector.shape_cast %225 : vector<1x1x96xf32> to vector<1x96xf32>
    %227 = vector.broadcast %226 : vector<1x96xf32> to vector<16x96xf32>
    %228 = arith.addf %224, %227 : vector<16x96xf32>
    %229 = arith.truncf %228 : vector<16x96xf32> to vector<16x96xbf16>
    %230 = vector.extract_strided_slice %33 {offsets = [0, 0], sizes = [1, 8], strides = [1, 1]} : vector<2x8xf32> to vector<1x8xf32>
    %231 = vector.extract_strided_slice %229 {offsets = [0, 0], sizes = [8, 16], strides = [1, 1]} : vector<16x96xbf16> to vector<8x16xbf16>
    %232 = vector.extract_strided_slice %229 {offsets = [0, 32], sizes = [8, 16], strides = [1, 1]} : vector<16x96xbf16> to vector<8x16xbf16>
    %233 = vector.extract_strided_slice %229 {offsets = [0, 64], sizes = [8, 16], strides = [1, 1]} : vector<16x96xbf16> to vector<8x16xbf16>
    %234 = tpu.transpose %232, [1, 0] : vector<8x16xbf16> -> vector<16x8xbf16>
    %cst_99 = arith.constant dense<0.000000e+00> : vector<8x8xf32>
    %235 = tpu.matmul %231, %234, %cst_99 {dimension_numbers = #tpu.dot_dimension_numbers<[1], [0], [0], [1], [0, 0, 1, 1], [], []>} : vector<8x16xbf16>, vector<16x8xbf16>, vector<8x8xf32> -> vector<8x8xf32>
    %236 = vector.broadcast %230 : vector<1x8xf32> to vector<8x8xf32>
    %237 = arith.addf %235, %236 : vector<8x8xf32>
    %cst_100 = arith.constant dense<0xFF800000> : vector<8xf32>
    %238 = vector.multi_reduction <maximumf>, %237, %cst_100 [1] : vector<8x8xf32> to vector<8xf32>
    %239 = vector.shape_cast %238 : vector<8xf32> to vector<8x1xf32>
    %240 = vector.broadcast %239 : vector<8x1xf32> to vector<8x8xf32>
    %241 = arith.subf %237, %240 : vector<8x8xf32>
    %242 = math.exp %241 : vector<8x8xf32>
    %cst_101 = arith.constant dense<0.000000e+00> : vector<8xf32>
    %243 = vector.multi_reduction <add>, %242, %cst_101 [1] : vector<8x8xf32> to vector<8xf32>
    %244 = vector.shape_cast %243 : vector<8xf32> to vector<8x1xf32>
    %245 = tpu.reciprocal %244 {approx = true} : vector<8x1xf32> -> vector<8x1xf32>
    %246 = vector.broadcast %245 : vector<8x1xf32> to vector<8x8xf32>
    %247 = arith.mulf %242, %246 : vector<8x8xf32>
    %248 = arith.truncf %247 : vector<8x8xf32> to vector<8x8xbf16>
    %cst_102 = arith.constant dense<0.000000e+00> : vector<8x16xf32>
    %249 = tpu.matmul %248, %233, %cst_102 {dimension_numbers = #tpu.dot_dimension_numbers<[1], [0], [0], [1], [0, 0, 1, 1], [], []>} : vector<8x8xbf16>, vector<8x16xbf16>, vector<8x16xf32> -> vector<8x16xf32>
    %c0_103 = arith.constant 0 : index
    %c0_104 = arith.constant 0 : index
    %250 = vector.load %arg25[%c0_103, %c0_104] : memref<16x32xf32, #tpu.memory_space<vmem>>, vector<8x16xf32>
    tpu.vector_store %arg25[%c0_103, %c0_104], %249 {strides = array<i32>} : memref<16x32xf32, #tpu.memory_space<vmem>>, vector<8x16xf32>,
    %251 = vector.extract_strided_slice %229 {offsets = [0, 16], sizes = [8, 16], strides = [1, 1]} : vector<16x96xbf16> to vector<8x16xbf16>
    %252 = vector.extract_strided_slice %229 {offsets = [0, 48], sizes = [8, 16], strides = [1, 1]} : vector<16x96xbf16> to vector<8x16xbf16>
    %253 = vector.extract_strided_slice %229 {offsets = [0, 80], sizes = [8, 16], strides = [1, 1]} : vector<16x96xbf16> to vector<8x16xbf16>
    %254 = tpu.transpose %252, [1, 0] : vector<8x16xbf16> -> vector<16x8xbf16>
    %cst_105 = arith.constant dense<0.000000e+00> : vector<8x8xf32>
    %255 = tpu.matmul %251, %254, %cst_105 {dimension_numbers = #tpu.dot_dimension_numbers<[1], [0], [0], [1], [0, 0, 1, 1], [], []>} : vector<8x16xbf16>, vector<16x8xbf16>, vector<8x8xf32> -> vector<8x8xf32>
    %256 = vector.broadcast %230 : vector<1x8xf32> to vector<8x8xf32>
    %257 = arith.addf %255, %256 : vector<8x8xf32>
    %cst_106 = arith.constant dense<0xFF800000> : vector<8xf32>
    %258 = vector.multi_reduction <maximumf>, %257, %cst_106 [1] : vector<8x8xf32> to vector<8xf32>
    %259 = vector.shape_cast %258 : vector<8xf32> to vector<8x1xf32>
    %260 = vector.broadcast %259 : vector<8x1xf32> to vector<8x8xf32>
    %261 = arith.subf %257, %260 : vector<8x8xf32>
    %262 = math.exp %261 : vector<8x8xf32>
    %cst_107 = arith.constant dense<0.000000e+00> : vector<8xf32>
    %263 = vector.multi_reduction <add>, %262, %cst_107 [1] : vector<8x8xf32> to vector<8xf32>
    %264 = vector.shape_cast %263 : vector<8xf32> to vector<8x1xf32>
    %265 = tpu.reciprocal %264 {approx = true} : vector<8x1xf32> -> vector<8x1xf32>
    %266 = vector.broadcast %265 : vector<8x1xf32> to vector<8x8xf32>
    %267 = arith.mulf %262, %266 : vector<8x8xf32>
    %268 = arith.truncf %267 : vector<8x8xf32> to vector<8x8xbf16>
    %cst_108 = arith.constant dense<0.000000e+00> : vector<8x16xf32>
    %269 = tpu.matmul %268, %253, %cst_108 {dimension_numbers = #tpu.dot_dimension_numbers<[1], [0], [0], [1], [0, 0, 1, 1], [], []>} : vector<8x8xbf16>, vector<8x16xbf16>, vector<8x16xf32> -> vector<8x16xf32>
    %c0_109 = arith.constant 0 : index
    %c16_110 = arith.constant 16 : index
    %270 = vector.load %arg25[%c0_109, %c16_110] : memref<16x32xf32, #tpu.memory_space<vmem>>, vector<8x16xf32>
    tpu.vector_store %arg25[%c0_109, %c16_110], %269 {strides = array<i32>} : memref<16x32xf32, #tpu.memory_space<vmem>>, vector<8x16xf32>,
    %271 = vector.extract_strided_slice %33 {offsets = [1, 0], sizes = [1, 8], strides = [1, 1]} : vector<2x8xf32> to vector<1x8xf32>
    %272 = vector.extract_strided_slice %229 {offsets = [8, 0], sizes = [8, 16], strides = [1, 1]} : vector<16x96xbf16> to vector<8x16xbf16>
    %273 = vector.extract_strided_slice %229 {offsets = [8, 32], sizes = [8, 16], strides = [1, 1]} : vector<16x96xbf16> to vector<8x16xbf16>
    %274 = vector.extract_strided_slice %229 {offsets = [8, 64], sizes = [8, 16], strides = [1, 1]} : vector<16x96xbf16> to vector<8x16xbf16>
    %275 = tpu.transpose %273, [1, 0] : vector<8x16xbf16> -> vector<16x8xbf16>
    %cst_111 = arith.constant dense<0.000000e+00> : vector<8x8xf32>
    %276 = tpu.matmul %272, %275, %cst_111 {dimension_numbers = #tpu.dot_dimension_numbers<[1], [0], [0], [1], [0, 0, 1, 1], [], []>} : vector<8x16xbf16>, vector<16x8xbf16>, vector<8x8xf32> -> vector<8x8xf32>
    %277 = vector.broadcast %271 : vector<1x8xf32> to vector<8x8xf32>
    %278 = arith.addf %276, %277 : vector<8x8xf32>
    %cst_112 = arith.constant dense<0xFF800000> : vector<8xf32>
    %279 = vector.multi_reduction <maximumf>, %278, %cst_112 [1] : vector<8x8xf32> to vector<8xf32>
    %280 = vector.shape_cast %279 : vector<8xf32> to vector<8x1xf32>
    %281 = vector.broadcast %280 : vector<8x1xf32> to vector<8x8xf32>
    %282 = arith.subf %278, %281 : vector<8x8xf32>
    %283 = math.exp %282 : vector<8x8xf32>
    %cst_113 = arith.constant dense<0.000000e+00> : vector<8xf32>
    %284 = vector.multi_reduction <add>, %283, %cst_113 [1] : vector<8x8xf32> to vector<8xf32>
    %285 = vector.shape_cast %284 : vector<8xf32> to vector<8x1xf32>
    %286 = tpu.reciprocal %285 {approx = true} : vector<8x1xf32> -> vector<8x1xf32>
    %287 = vector.broadcast %286 : vector<8x1xf32> to vector<8x8xf32>
    %288 = arith.mulf %283, %287 : vector<8x8xf32>
    %289 = arith.truncf %288 : vector<8x8xf32> to vector<8x8xbf16>
    %cst_114 = arith.constant dense<0.000000e+00> : vector<8x16xf32>
    %290 = tpu.matmul %289, %274, %cst_114 {dimension_numbers = #tpu.dot_dimension_numbers<[1], [0], [0], [1], [0, 0, 1, 1], [], []>} : vector<8x8xbf16>, vector<8x16xbf16>, vector<8x16xf32> -> vector<8x16xf32>
    %c8_115 = arith.constant 8 : index
    %c0_116 = arith.constant 0 : index
    %291 = vector.load %arg25[%c8_115, %c0_116] : memref<16x32xf32, #tpu.memory_space<vmem>>, vector<8x16xf32>
    tpu.vector_store %arg25[%c8_115, %c0_116], %290 {strides = array<i32>} : memref<16x32xf32, #tpu.memory_space<vmem>>, vector<8x16xf32>,
    %292 = vector.extract_strided_slice %229 {offsets = [8, 16], sizes = [8, 16], strides = [1, 1]} : vector<16x96xbf16> to vector<8x16xbf16>
    %293 = vector.extract_strided_slice %229 {offsets = [8, 48], sizes = [8, 16], strides = [1, 1]} : vector<16x96xbf16> to vector<8x16xbf16>
    %294 = vector.extract_strided_slice %229 {offsets = [8, 80], sizes = [8, 16], strides = [1, 1]} : vector<16x96xbf16> to vector<8x16xbf16>
    %295 = tpu.transpose %293, [1, 0] : vector<8x16xbf16> -> vector<16x8xbf16>
    %cst_117 = arith.constant dense<0.000000e+00> : vector<8x8xf32>
    %296 = tpu.matmul %292, %295, %cst_117 {dimension_numbers = #tpu.dot_dimension_numbers<[1], [0], [0], [1], [0, 0, 1, 1], [], []>} : vector<8x16xbf16>, vector<16x8xbf16>, vector<8x8xf32> -> vector<8x8xf32>
    %297 = vector.broadcast %271 : vector<1x8xf32> to vector<8x8xf32>
    %298 = arith.addf %296, %297 : vector<8x8xf32>
    %cst_118 = arith.constant dense<0xFF800000> : vector<8xf32>
    %299 = vector.multi_reduction <maximumf>, %298, %cst_118 [1] : vector<8x8xf32> to vector<8xf32>
    %300 = vector.shape_cast %299 : vector<8xf32> to vector<8x1xf32>
    %301 = vector.broadcast %300 : vector<8x1xf32> to vector<8x8xf32>
    %302 = arith.subf %298, %301 : vector<8x8xf32>
    %303 = math.exp %302 : vector<8x8xf32>
    %cst_119 = arith.constant dense<0.000000e+00> : vector<8xf32>
    %304 = vector.multi_reduction <add>, %303, %cst_119 [1] : vector<8x8xf32> to vector<8xf32>
    %305 = vector.shape_cast %304 : vector<8xf32> to vector<8x1xf32>
    %306 = tpu.reciprocal %305 {approx = true} : vector<8x1xf32> -> vector<8x1xf32>
    %307 = vector.broadcast %306 : vector<8x1xf32> to vector<8x8xf32>
    %308 = arith.mulf %303, %307 : vector<8x8xf32>
    %309 = arith.truncf %308 : vector<8x8xf32> to vector<8x8xbf16>
    %cst_120 = arith.constant dense<0.000000e+00> : vector<8x16xf32>
    %310 = tpu.matmul %309, %294, %cst_120 {dimension_numbers = #tpu.dot_dimension_numbers<[1], [0], [0], [1], [0, 0, 1, 1], [], []>} : vector<8x8xbf16>, vector<8x16xbf16>, vector<8x16xf32> -> vector<8x16xf32>
    %c8_121 = arith.constant 8 : index
    %c16_122 = arith.constant 16 : index
    %311 = vector.load %arg25[%c8_121, %c16_122] : memref<16x32xf32, #tpu.memory_space<vmem>>, vector<8x16xf32>
    tpu.vector_store %arg25[%c8_121, %c16_122], %310 {strides = array<i32>} : memref<16x32xf32, #tpu.memory_space<vmem>>, vector<8x16xf32>,
    %c0_123 = arith.constant 0 : index
    %c0_124 = arith.constant 0 : index
    %312 = vector.load %arg25[%c0_123, %c0_124] : memref<16x32xf32, #tpu.memory_space<vmem>>, vector<16x32xf32>
    %313 = arith.truncf %312 : vector<16x32xf32> to vector<16x32xbf16>
    %c1_125 = arith.constant 1 : index
    %c0_126 = arith.constant 0 : index
    %c0_127 = arith.constant 0 : index
    %314 = vector.load %arg7[%c1_125, %c0_126, %c0_127] : memref<2x32x32xbf16, #tpu.memory_space<vmem>>, vector<1x32x32xbf16>
    %315 = vector.shape_cast %314 : vector<1x32x32xbf16> to vector<32x32xbf16>
    %cst_128 = arith.constant dense<0.000000e+00> : vector<16x32xf32>
    %316 = tpu.matmul %313, %315, %cst_128 {dimension_numbers = #tpu.dot_dimension_numbers<[1], [0], [0], [1], [0, 0, 1, 1], [], []>} : vector<16x32xbf16>, vector<32x32xbf16>, vector<16x32xf32> -> vector<16x32xf32>
    %c1_129 = arith.constant 1 : index
    %c0_130 = arith.constant 0 : index
    %c0_131 = arith.constant 0 : index
    %317 = vector.load %arg8[%c1_129, %c0_130, %c0_131] : memref<2x1x32xf32, #tpu.memory_space<vmem>>, vector<1x1x32xf32>
    %318 = vector.shape_cast %317 : vector<1x1x32xf32> to vector<1x32xf32>
    %319 = vector.broadcast %318 : vector<1x32xf32> to vector<16x32xf32>
    %320 = arith.addf %316, %319 : vector<16x32xf32>
    %321 = arith.addf %320, %220 : vector<16x32xf32>
    %c1_132 = arith.constant 1 : index
    %c0_133 = arith.constant 0 : index
    %c0_134 = arith.constant 0 : index
    %322 = vector.load %arg9[%c1_132, %c0_133, %c0_134] : memref<2x1x32xf32, #tpu.memory_space<vmem>>, vector<1x1x32xf32>
    %323 = vector.shape_cast %322 : vector<1x1x32xf32> to vector<1x32xf32>
    %c1_135 = arith.constant 1 : index
    %c0_136 = arith.constant 0 : index
    %c0_137 = arith.constant 0 : index
    %324 = vector.load %arg10[%c1_135, %c0_136, %c0_137] : memref<2x1x32xf32, #tpu.memory_space<vmem>>, vector<1x1x32xf32>
    %325 = vector.shape_cast %324 : vector<1x1x32xf32> to vector<1x32xf32>
    %cst_138 = arith.constant dense<0.000000e+00> : vector<16xf32>
    %326 = vector.multi_reduction <add>, %321, %cst_138 [1] : vector<16x32xf32> to vector<16xf32>
    %327 = vector.shape_cast %326 : vector<16xf32> to vector<16x1xf32>
    %cst_139 = arith.constant 3.200000e+01 : f32
    %328 = vector.broadcast %cst_139 : f32 to vector<16x1xf32>
    %329 = arith.divf %327, %328 : vector<16x1xf32>
    %330 = vector.broadcast %329 : vector<16x1xf32> to vector<16x32xf32>
    %331 = arith.subf %321, %330 : vector<16x32xf32>
    %332 = vector.broadcast %329 : vector<16x1xf32> to vector<16x32xf32>
    %333 = arith.subf %321, %332 : vector<16x32xf32>
    %334 = arith.mulf %331, %333 : vector<16x32xf32>
    %cst_140 = arith.constant dense<0.000000e+00> : vector<16xf32>
    %335 = vector.multi_reduction <add>, %334, %cst_140 [1] : vector<16x32xf32> to vector<16xf32>
    %336 = vector.shape_cast %335 : vector<16xf32> to vector<16x1xf32>
    %cst_141 = arith.constant 3.200000e+01 : f32
    %337 = vector.broadcast %cst_141 : f32 to vector<16x1xf32>
    %338 = arith.divf %336, %337 : vector<16x1xf32>
    %339 = vector.broadcast %329 : vector<16x1xf32> to vector<16x32xf32>
    %340 = arith.subf %321, %339 : vector<16x32xf32>
    %cst_142 = arith.constant 9.99999996E-13 : f32
    %341 = vector.broadcast %cst_142 : f32 to vector<16x1xf32>
    %342 = arith.addf %338, %341 : vector<16x1xf32>
    %343 = math.rsqrt %342 : vector<16x1xf32>
    %344 = vector.broadcast %343 : vector<16x1xf32> to vector<16x32xf32>
    %345 = arith.mulf %340, %344 : vector<16x32xf32>
    %346 = vector.broadcast %323 : vector<1x32xf32> to vector<16x32xf32>
    %347 = arith.mulf %345, %346 : vector<16x32xf32>
    %348 = vector.broadcast %325 : vector<1x32xf32> to vector<16x32xf32>
    %349 = arith.addf %347, %348 : vector<16x32xf32>
    %350 = arith.truncf %349 : vector<16x32xf32> to vector<16x32xbf16>
    %c1_143 = arith.constant 1 : index
    %c0_144 = arith.constant 0 : index
    %c0_145 = arith.constant 0 : index
    %351 = vector.load %arg11[%c1_143, %c0_144, %c0_145] : memref<2x32x64xbf16, #tpu.memory_space<vmem>>, vector<1x32x64xbf16>
    %352 = vector.shape_cast %351 : vector<1x32x64xbf16> to vector<32x64xbf16>
    %cst_146 = arith.constant dense<0.000000e+00> : vector<16x64xf32>
    %353 = tpu.matmul %350, %352, %cst_146 {dimension_numbers = #tpu.dot_dimension_numbers<[1], [0], [0], [1], [0, 0, 1, 1], [], []>} : vector<16x32xbf16>, vector<32x64xbf16>, vector<16x64xf32> -> vector<16x64xf32>
    %c1_147 = arith.constant 1 : index
    %c0_148 = arith.constant 0 : index
    %c0_149 = arith.constant 0 : index
    %354 = vector.load %arg12[%c1_147, %c0_148, %c0_149] : memref<2x1x64xf32, #tpu.memory_space<vmem>>, vector<1x1x64xf32>
    %355 = vector.shape_cast %354 : vector<1x1x64xf32> to vector<1x64xf32>
    %356 = vector.broadcast %355 : vector<1x64xf32> to vector<16x64xf32>
    %357 = arith.addf %353, %356 : vector<16x64xf32>
    %cst_150 = arith.constant 5.000000e-01 : f32
    %358 = vector.broadcast %cst_150 : f32 to vector<16x64xf32>
    %359 = arith.mulf %358, %357 : vector<16x64xf32>
    %cst_151 = arith.constant 4.471500e-02 : f32
    %360 = vector.broadcast %cst_151 : f32 to vector<16x64xf32>
    %361 = arith.mulf %360, %357 : vector<16x64xf32>
    %362 = arith.mulf %361, %357 : vector<16x64xf32>
    %363 = arith.mulf %362, %357 : vector<16x64xf32>
    %364 = arith.addf %357, %363 : vector<16x64xf32>
    %cst_152 = arith.constant 0.797884583 : f32
    %365 = vector.broadcast %cst_152 : f32 to vector<16x64xf32>
    %366 = arith.mulf %365, %364 : vector<16x64xf32>
    %367 = math.tanh %366 : vector<16x64xf32>
    %cst_153 = arith.constant 1.000000e+00 : f32
    %368 = vector.broadcast %cst_153 : f32 to vector<16x64xf32>
    %369 = arith.addf %368, %367 : vector<16x64xf32>
    %370 = arith.mulf %359, %369 : vector<16x64xf32>
    %371 = arith.truncf %370 : vector<16x64xf32> to vector<16x64xbf16>
    %c1_154 = arith.constant 1 : index
    %c0_155 = arith.constant 0 : index
    %c0_156 = arith.constant 0 : index
    %372 = vector.load %arg13[%c1_154, %c0_155, %c0_156] : memref<2x64x32xbf16, #tpu.memory_space<vmem>>, vector<1x64x32xbf16>
    %373 = vector.shape_cast %372 : vector<1x64x32xbf16> to vector<64x32xbf16>
    %cst_157 = arith.constant dense<0.000000e+00> : vector<16x32xf32>
    %374 = tpu.matmul %371, %373, %cst_157 {dimension_numbers = #tpu.dot_dimension_numbers<[1], [0], [0], [1], [0, 0, 1, 1], [], []>} : vector<16x64xbf16>, vector<64x32xbf16>, vector<16x32xf32> -> vector<16x32xf32>
    %c1_158 = arith.constant 1 : index
    %c0_159 = arith.constant 0 : index
    %c0_160 = arith.constant 0 : index
    %375 = vector.load %arg14[%c1_158, %c0_159, %c0_160] : memref<2x1x32xf32, #tpu.memory_space<vmem>>, vector<1x1x32xf32>
    %376 = vector.shape_cast %375 : vector<1x1x32xf32> to vector<1x32xf32>
    %377 = vector.broadcast %376 : vector<1x32xf32> to vector<16x32xf32>
    %378 = arith.addf %374, %377 : vector<16x32xf32>
    %379 = arith.addf %378, %349 : vector<16x32xf32>
    %c1_161 = arith.constant 1 : index
    %c0_162 = arith.constant 0 : index
    %c0_163 = arith.constant 0 : index
    %380 = vector.load %arg15[%c1_161, %c0_162, %c0_163] : memref<2x1x32xf32, #tpu.memory_space<vmem>>, vector<1x1x32xf32>
    %381 = vector.shape_cast %380 : vector<1x1x32xf32> to vector<1x32xf32>
    %c1_164 = arith.constant 1 : index
    %c0_165 = arith.constant 0 : index
    %c0_166 = arith.constant 0 : index
    %382 = vector.load %arg16[%c1_164, %c0_165, %c0_166] : memref<2x1x32xf32, #tpu.memory_space<vmem>>, vector<1x1x32xf32>
    %383 = vector.shape_cast %382 : vector<1x1x32xf32> to vector<1x32xf32>
    %cst_167 = arith.constant dense<0.000000e+00> : vector<16xf32>
    %384 = vector.multi_reduction <add>, %379, %cst_167 [1] : vector<16x32xf32> to vector<16xf32>
    %385 = vector.shape_cast %384 : vector<16xf32> to vector<16x1xf32>
    %cst_168 = arith.constant 3.200000e+01 : f32
    %386 = vector.broadcast %cst_168 : f32 to vector<16x1xf32>
    %387 = arith.divf %385, %386 : vector<16x1xf32>
    %388 = vector.broadcast %387 : vector<16x1xf32> to vector<16x32xf32>
    %389 = arith.subf %379, %388 : vector<16x32xf32>
    %390 = vector.broadcast %387 : vector<16x1xf32> to vector<16x32xf32>
    %391 = arith.subf %379, %390 : vector<16x32xf32>
    %392 = arith.mulf %389, %391 : vector<16x32xf32>
    %cst_169 = arith.constant dense<0.000000e+00> : vector<16xf32>
    %393 = vector.multi_reduction <add>, %392, %cst_169 [1] : vector<16x32xf32> to vector<16xf32>
    %394 = vector.shape_cast %393 : vector<16xf32> to vector<16x1xf32>
    %cst_170 = arith.constant 3.200000e+01 : f32
    %395 = vector.broadcast %cst_170 : f32 to vector<16x1xf32>
    %396 = arith.divf %394, %395 : vector<16x1xf32>
    %397 = vector.broadcast %387 : vector<16x1xf32> to vector<16x32xf32>
    %398 = arith.subf %379, %397 : vector<16x32xf32>
    %cst_171 = arith.constant 9.99999996E-13 : f32
    %399 = vector.broadcast %cst_171 : f32 to vector<16x1xf32>
    %400 = arith.addf %396, %399 : vector<16x1xf32>
    %401 = math.rsqrt %400 : vector<16x1xf32>
    %402 = vector.broadcast %401 : vector<16x1xf32> to vector<16x32xf32>
    %403 = arith.mulf %398, %402 : vector<16x32xf32>
    %404 = vector.broadcast %381 : vector<1x32xf32> to vector<16x32xf32>
    %405 = arith.mulf %403, %404 : vector<16x32xf32>
    %406 = vector.broadcast %383 : vector<1x32xf32> to vector<16x32xf32>
    %407 = arith.addf %405, %406 : vector<16x32xf32>
    %408 = vector.extract_strided_slice %407 {offsets = [0, 0], sizes = [1, 32], strides = [1, 1]} : vector<16x32xf32> to vector<1x32xf32>
    %409 = vector.extract_strided_slice %407 {offsets = [8, 0], sizes = [1, 32], strides = [1, 1]} : vector<16x32xf32> to vector<1x32xf32>
    %410 = tpu.concatenate %408, %409 in 0 : vector<1x32xf32>, vector<1x32xf32> -> vector<2x32xf32>
    %411 = arith.truncf %410 : vector<2x32xf32> to vector<2x32xbf16>
    %c0_172 = arith.constant 0 : index
    %c0_173 = arith.constant 0 : index
    %412 = vector.load %arg17[%c0_172, %c0_173] : memref<32x32xbf16, #tpu.memory_space<vmem>>, vector<32x32xbf16>
    %cst_174 = arith.constant dense<0.000000e+00> : vector<2x32xf32>
    %413 = tpu.matmul %411, %412, %cst_174 {dimension_numbers = #tpu.dot_dimension_numbers<[1], [0], [0], [1], [0, 0, 1, 1], [], []>} : vector<2x32xbf16>, vector<32x32xbf16>, vector<2x32xf32> -> vector<2x32xf32>
    %c0_175 = arith.constant 0 : index
    %c0_176 = arith.constant 0 : index
    %414 = vector.load %arg18[%c0_175, %c0_176] : memref<1x32xf32, #tpu.memory_space<vmem>>, vector<1x32xf32>
    %415 = vector.broadcast %414 : vector<1x32xf32> to vector<2x32xf32>
    %416 = arith.addf %413, %415 : vector<2x32xf32>
    %417 = math.tanh %416 : vector<2x32xf32>
    %418 = arith.truncf %417 : vector<2x32xf32> to vector<2x32xbf16>
    %c0_177 = arith.constant 0 : index
    %c0_178 = arith.constant 0 : index
    %419 = vector.load %arg19[%c0_177, %c0_178] : memref<32x3xbf16, #tpu.memory_space<vmem>>, vector<32x3xbf16>
    %cst_179 = arith.constant dense<0.000000e+00> : vector<2x3xf32>
    %420 = tpu.matmul %418, %419, %cst_179 {dimension_numbers = #tpu.dot_dimension_numbers<[1], [0], [0], [1], [0, 0, 1, 1], [], []>} : vector<2x32xbf16>, vector<32x3xbf16>, vector<2x3xf32> -> vector<2x3xf32>
    %c0_180 = arith.constant 0 : index
    %c0_181 = arith.constant 0 : index
    %421 = vector.load %arg20[%c0_180, %c0_181] : memref<1x3xf32, #tpu.memory_space<vmem>>, vector<1x3xf32>
    %422 = vector.broadcast %421 : vector<1x3xf32> to vector<2x3xf32>
    %423 = arith.addf %420, %422 : vector<2x3xf32>
    %c0_182 = arith.constant 0 : index
    %c0_183 = arith.constant 0 : index
    %c0_184 = arith.constant 0 : index
    %424 = vector.load %arg23[%c0_182, %c0_183, %c0_184] : memref<1x2x3xf32, #tpu.memory_space<vmem>>, vector<1x2x3xf32>
    %425 = vector.shape_cast %424 : vector<1x2x3xf32> to vector<2x3xf32>
    %426 = vector.shape_cast %423 : vector<2x3xf32> to vector<1x2x3xf32>
    tpu.vector_store %arg23[%c0_182, %c0_183, %c0_184], %426 {strides = array<i32>} : memref<1x2x3xf32, #tpu.memory_space<vmem>>, vector<1x2x3xf32>,
    %cst_185 = arith.constant dense<0xFF800000> : vector<2xf32>
    %427 = vector.multi_reduction <maximumf>, %423, %cst_185 [1] : vector<2x3xf32> to vector<2xf32>
    %428 = vector.shape_cast %427 : vector<2xf32> to vector<2x1xf32>
    %429 = vector.broadcast %428 : vector<2x1xf32> to vector<2x3xf32>
    %430 = arith.subf %423, %429 : vector<2x3xf32>
    %431 = math.exp %430 : vector<2x3xf32>
    %cst_186 = arith.constant dense<0.000000e+00> : vector<2xf32>
    %432 = vector.multi_reduction <add>, %431, %cst_186 [1] : vector<2x3xf32> to vector<2xf32>
    %433 = vector.shape_cast %432 : vector<2xf32> to vector<2x1xf32>
    %434 = math.log %433 : vector<2x1xf32>
    %435 = vector.broadcast %434 : vector<2x1xf32> to vector<2x3xf32>
    %436 = arith.subf %430, %435 : vector<2x3xf32>
    %c0_187 = arith.constant 0 : index
    %c0_188 = arith.constant 0 : index
    %c0_189 = arith.constant 0 : index
    %437 = vector.load %arg21[%c0_187, %c0_188, %c0_189] : memref<1x2x3xf32, #tpu.memory_space<vmem>>, vector<1x2x3xf32>
    %438 = vector.shape_cast %437 : vector<1x2x3xf32> to vector<2x3xf32>
    %c0_190 = arith.constant 0 : index
    %c0_191 = arith.constant 0 : index
    %439 = vector.load %arg22[%c0_190, %c0_191] : memref<1x3xf32, #tpu.memory_space<vmem>>, vector<1x3xf32>
    %440 = vector.broadcast %439 : vector<1x3xf32> to vector<2x3xf32>
    %441 = arith.mulf %438, %440 : vector<2x3xf32>
    %cst_192 = arith.constant dense<0.000000e+00> : vector<2xf32>
    %442 = vector.multi_reduction <add>, %441, %cst_192 [1] : vector<2x3xf32> to vector<2xf32>
    %443 = vector.shape_cast %442 : vector<2xf32> to vector<2x1xf32>
    %444 = arith.mulf %438, %436 : vector<2x3xf32>
    %cst_193 = arith.constant dense<0.000000e+00> : vector<2xf32>
    %445 = vector.multi_reduction <add>, %444, %cst_193 [1] : vector<2x3xf32> to vector<2xf32>
    %446 = vector.shape_cast %445 : vector<2xf32> to vector<2x1xf32>
    %cst_194 = arith.constant 0.000000e+00 : f32
    %447 = vector.broadcast %cst_194 : f32 to vector<2x1xf32>
    %448 = arith.subf %447, %446 : vector<2x1xf32>
    %449 = arith.mulf %443, %448 : vector<2x1xf32>
    %450 = tpu.concatenate %449, %443 in 1 : vector<2x1xf32>, vector<2x1xf32> -> vector<2x2xf32>
    %c0_195 = arith.constant 0 : index
    %c0_196 = arith.constant 0 : index
    %c0_197 = arith.constant 0 : index
    %451 = vector.load %arg24[%c0_195, %c0_196, %c0_197] : memref<1x2x2xf32, #tpu.memory_space<vmem>>, vector<1x2x2xf32>
    %452 = vector.shape_cast %451 : vector<1x2x2xf32> to vector<2x2xf32>
    %453 = vector.shape_cast %450 : vector<2x2xf32> to vector<1x2x2xf32>
    tpu.vector_store %arg24[%c0_195, %c0_196, %c0_197], %453 {strides = array<i32>} : memref<1x2x2xf32, #tpu.memory_space<vmem>>, vector<1x2x2xf32>,
    return
  }
  func.func @transform_0(%arg0: i32) -> (i32, i32, i32) {
    %c0_i32 = arith.constant 0 : i32
    %c0_i32_0 = arith.constant 0 : i32
    %c0_i32_1 = arith.constant 0 : i32
    return %arg0, %c0_i32, %c0_i32_0 : i32, i32, i32
  }
  func.func @transform_1(%arg0: i32) -> (i32, i32, i32) {
    %c0_i32 = arith.constant 0 : i32
    %c0_i32_0 = arith.constant 0 : i32
    %c0_i32_1 = arith.constant 0 : i32
    return %arg0, %c0_i32, %c0_i32_0 : i32, i32, i32
  }
  func.func @transform_2(%arg0: i32) -> (i32, i32) {
    %c0_i32 = arith.constant 0 : i32
    %c0_i32_0 = arith.constant 0 : i32
    %c0_i32_1 = arith.constant 0 : i32
    return %c0_i32, %c0_i32_0 : i32, i32
  }
  func.func @transform_3(%arg0: i32) -> (i32, i32) {
    %c0_i32 = arith.constant 0 : i32
    %c0_i32_0 = arith.constant 0 : i32
    %c0_i32_1 = arith.constant 0 : i32
    return %c0_i32, %c0_i32_0 : i32, i32
  }
  func.func @transform_4(%arg0: i32) -> (i32, i32, i32) {
    %c0_i32 = arith.constant 0 : i32
    %c0_i32_0 = arith.constant 0 : i32
    %c0_i32_1 = arith.constant 0 : i32
    %c0_i32_2 = arith.constant 0 : i32
    return %c0_i32, %c0_i32_0, %c0_i32_1 : i32, i32, i32
  }
  func.func @transform_5(%arg0: i32) -> (i32, i32, i32) {
    %c0_i32 = arith.constant 0 : i32
    %c0_i32_0 = arith.constant 0 : i32
    %c0_i32_1 = arith.constant 0 : i32
    %c0_i32_2 = arith.constant 0 : i32
    return %c0_i32, %c0_i32_0, %c0_i32_1 : i32, i32, i32
  }
  func.func @transform_6(%arg0: i32) -> (i32, i32, i32) {
    %c0_i32 = arith.constant 0 : i32
    %c0_i32_0 = arith.constant 0 : i32
    %c0_i32_1 = arith.constant 0 : i32
    %c0_i32_2 = arith.constant 0 : i32
    return %c0_i32, %c0_i32_0, %c0_i32_1 : i32, i32, i32
  }
  func.func @transform_7(%arg0: i32) -> (i32, i32, i32) {
    %c0_i32 = arith.constant 0 : i32
    %c0_i32_0 = arith.constant 0 : i32
    %c0_i32_1 = arith.constant 0 : i32
    %c0_i32_2 = arith.constant 0 : i32
    return %c0_i32, %c0_i32_0, %c0_i32_1 : i32, i32, i32
  }
  func.func @transform_8(%arg0: i32) -> (i32, i32, i32) {
    %c0_i32 = arith.constant 0 : i32
    %c0_i32_0 = arith.constant 0 : i32
    %c0_i32_1 = arith.constant 0 : i32
    %c0_i32_2 = arith.constant 0 : i32
    return %c0_i32, %c0_i32_0, %c0_i32_1 : i32, i32, i32
  }
  func.func @transform_9(%arg0: i32) -> (i32, i32, i32) {
    %c0_i32 = arith.constant 0 : i32
    %c0_i32_0 = arith.constant 0 : i32
    %c0_i32_1 = arith.constant 0 : i32
    %c0_i32_2 = arith.constant 0 : i32
    return %c0_i32, %c0_i32_0, %c0_i32_1 : i32, i32, i32
  }
  func.func @transform_10(%arg0: i32) -> (i32, i32, i32) {
    %c0_i32 = arith.constant 0 : i32
    %c0_i32_0 = arith.constant 0 : i32
    %c0_i32_1 = arith.constant 0 : i32
    %c0_i32_2 = arith.constant 0 : i32
    return %c0_i32, %c0_i32_0, %c0_i32_1 : i32, i32, i32
  }
  func.func @transform_11(%arg0: i32) -> (i32, i32, i32) {
    %c0_i32 = arith.constant 0 : i32
    %c0_i32_0 = arith.constant 0 : i32
    %c0_i32_1 = arith.constant 0 : i32
    %c0_i32_2 = arith.constant 0 : i32
    return %c0_i32, %c0_i32_0, %c0_i32_1 : i32, i32, i32
  }
  func.func @transform_12(%arg0: i32) -> (i32, i32, i32) {
    %c0_i32 = arith.constant 0 : i32
    %c0_i32_0 = arith.constant 0 : i32
    %c0_i32_1 = arith.constant 0 : i32
    %c0_i32_2 = arith.constant 0 : i32
    return %c0_i32, %c0_i32_0, %c0_i32_1 : i32, i32, i32
  }
  func.func @transform_13(%arg0: i32) -> (i32, i32, i32) {
    %c0_i32 = arith.constant 0 : i32
    %c0_i32_0 = arith.constant 0 : i32
    %c0_i32_1 = arith.constant 0 : i32
    %c0_i32_2 = arith.constant 0 : i32
    return %c0_i32, %c0_i32_0, %c0_i32_1 : i32, i32, i32
  }
  func.func @transform_14(%arg0: i32) -> (i32, i32, i32) {
    %c0_i32 = arith.constant 0 : i32
    %c0_i32_0 = arith.constant 0 : i32
    %c0_i32_1 = arith.constant 0 : i32
    %c0_i32_2 = arith.constant 0 : i32
    return %c0_i32, %c0_i32_0, %c0_i32_1 : i32, i32, i32
  }
  func.func @transform_15(%arg0: i32) -> (i32, i32, i32) {
    %c0_i32 = arith.constant 0 : i32
    %c0_i32_0 = arith.constant 0 : i32
    %c0_i32_1 = arith.constant 0 : i32
    %c0_i32_2 = arith.constant 0 : i32
    return %c0_i32, %c0_i32_0, %c0_i32_1 : i32, i32, i32
  }
  func.func @transform_16(%arg0: i32) -> (i32, i32) {
    %c0_i32 = arith.constant 0 : i32
    %c0_i32_0 = arith.constant 0 : i32
    %c0_i32_1 = arith.constant 0 : i32
    return %c0_i32, %c0_i32_0 : i32, i32
  }
  func.func @transform_17(%arg0: i32) -> (i32, i32) {
    %c0_i32 = arith.constant 0 : i32
    %c0_i32_0 = arith.constant 0 : i32
    %c0_i32_1 = arith.constant 0 : i32
    return %c0_i32, %c0_i32_0 : i32, i32
  }
  func.func @transform_18(%arg0: i32) -> (i32, i32) {
    %c0_i32 = arith.constant 0 : i32
    %c0_i32_0 = arith.constant 0 : i32
    %c0_i32_1 = arith.constant 0 : i32
    return %c0_i32, %c0_i32_0 : i32, i32
  }
  func.func @transform_19(%arg0: i32) -> (i32, i32) {
    %c0_i32 = arith.constant 0 : i32
    %c0_i32_0 = arith.constant 0 : i32
    %c0_i32_1 = arith.constant 0 : i32
    return %c0_i32, %c0_i32_0 : i32, i32
  }
  func.func @transform_20(%arg0: i32) -> (i32, i32, i32) {
    %c0_i32 = arith.constant 0 : i32
    %c0_i32_0 = arith.constant 0 : i32
    %c0_i32_1 = arith.constant 0 : i32
    return %arg0, %c0_i32, %c0_i32_0 : i32, i32, i32
  }
  func.func @transform_21(%arg0: i32) -> (i32, i32) {
    %c0_i32 = arith.constant 0 : i32
    %c0_i32_0 = arith.constant 0 : i32
    %c0_i32_1 = arith.constant 0 : i32
    return %c0_i32, %c0_i32_0 : i32, i32
  }
  func.func @transform_22(%arg0: i32) -> (i32, i32, i32) {
    %c0_i32 = arith.constant 0 : i32
    %c0_i32_0 = arith.constant 0 : i32
    %c0_i32_1 = arith.constant 0 : i32
    return %arg0, %c0_i32, %c0_i32_0 : i32, i32, i32
  }
  func.func @transform_23(%arg0: i32) -> (i32, i32, i32) {
    %c0_i32 = arith.constant 0 : i32
    %c0_i32_0 = arith.constant 0 : i32
    %c0_i32_1 = arith.constant 0 : i32
    return %arg0, %c0_i32, %c0_i32_0 : i32, i32, i32
  }
}

</mosaic_0001>

<bundles_post_ra>
// kernel: transformer_classifier_forward.1
= control target key start
LH: loop header
LB: loop body
LE: loop exit
PB: predicated region body
PF: predicated region fallthrough
CT: control target
= control target key end

     0   :  { %s3068_s0 = inlined_call_operand.vmem [shape: f32[1,16,32], index: 0, kind: input, shape index: {}]   ;;  %s3069_s1 = inlined_call_operand.vmem [shape: f32[1,2,8], index: 1, kind: input, shape index: {}]   ;;  %s3070_s2 = inlined_call_operand.vmem [shape: f32[1,32], index: 2, kind: input, shape index: {}]   ;;  %s3071_s3 = inlined_call_operand.vmem [shape: f32[1,32], index: 3, kind: input, shape index: {}]   ;;  %s3072_s4 = inlined_call_operand.vmem [shape: bf16[2,32,96], index: 4, kind: input, shape index: {}]   ;;  %s3073_s5 = inlined_call_operand.vmem [shape: f32[2,1,96], index: 5, kind: input, shape index: {}]   ;;  %s3074_s6 = inlined_call_operand.vmem [shape: bf16[2,32,32], index: 6, kind: input, shape index: {}]   ;;  %s3075_s7 = inlined_call_operand.vmem [shape: f32[2,1,32], index: 7, kind: input, shape index: {}]   ;;  %s3076_s8 = inlined_call_operand.vmem [shape: f32[2,1,32], index: 8, kind: input, shape index: {}]   ;;  %s3077_s9 = inlined_call_operand.vmem [shape: f32[2,1,32], index: 9, kind: input, shape index: {}]   ;;  %s3078_s10 = inlined_call_operand.vmem [shape: bf16[2,32,64], index: 10, kind: input, shape index: {}]   ;;  %s3079_s11 = inlined_call_operand.vmem [shape: f32[2,1,64], index: 11, kind: input, shape index: {}]   ;;  %s3080_s12 = inlined_call_operand.vmem [shape: bf16[2,64,32], index: 12, kind: input, shape index: {}]   ;;  %s3081_s13 = inlined_call_operand.vmem [shape: f32[2,1,32], index: 13, kind: input, shape index: {}]   ;;  %s3082_s14 = inlined_call_operand.vmem [shape: f32[2,1,32], index: 14, kind: input, shape index: {}]   ;;  %s3083_s15 = inlined_call_operand.vmem [shape: f32[2,1,32], index: 15, kind: input, shape index: {}]   ;;  %s3084_s16 = inlined_call_operand.vmem [shape: bf16[32,32], index: 16, kind: input, shape index: {}]   ;;  %s3085_s17 = inlined_call_operand.vmem [shape: f32[1,32], index: 17, kind: input, shape index: {}]   ;;  %s3086_s18 = inlined_call_operand.vmem [shape: bf16[32,3], index: 18, kind: input, shape index: {}]   ;;  %s3087_s19 = inlined_call_operand.vmem [shape: f32[1,3], index: 19, kind: input, shape index: {}]   ;;  %s3088_s20 = inlined_call_operand.vmem [shape: f32[1,2,3], index: 20, kind: input, shape index: {}]   ;;  %s3089_s21 = inlined_call_operand.vmem [shape: f32[1,3], index: 21, kind: input, shape index: {}]   ;;  %s3090_s22 = inlined_call_operand.hbm [shape: f32[1,2,3], index: 22, kind: output, shape index: {0}]   ;;  %s3091_s23 = inlined_call_operand.vmem [shape: f32[1,2,2], index: 23, kind: output, shape index: {1}]  }
   0x1   :  { %3103 = sst [smem:[#allocation6_spill]] %s3068_s0 }
   0x2   :  { %3104 = sst [smem:[#allocation7_spill]] %s3069_s1 }
   0x3   :  { %3105 = sst [smem:[#allocation8_spill]] %s3070_s2 }
   0x4   :  { %3106 = sst [smem:[#allocation9_spill]] %s3071_s3 }
   0x5   :  { %3107 = sst [smem:[#allocation10_spill]] %s3072_s4 }
   0x6   :  { %3108 = sst [smem:[#allocation11_spill]] %s3073_s5 }
   0x7   :  { %3109 = sst [smem:[#allocation12_spill]] %s3074_s6 }
   0x8   :  { %3110 = sst [smem:[#allocation13_spill]] %s3075_s7 }
   0x9   :  { %s3111_s24 = sld [smem:[#allocation6_spill]]  ;;  %vm79_vm0 = vcmask 261120  }
   0xf   :  { %v75_v0 = vld [vmem:[%s3111_s24] sm:$0xff]  ;;  %v76_v1 = vld [vmem:[%s3111_s24 + $0x8] sm:$0xff] }
  0x10   :  { %v80_v2 = vsel %vm79_vm0, %v75_v0, 0.0  ;;  %v83_v3 = vsel %vm79_vm0, %v76_v1, 0.0 }
  0x11   :  { %81 = vadd.xlane.f32.xlu0 %v80_v2 }
  0x15   :  { %84 = vadd.xlane.f32.xlu0 %v83_v3 }
  0x16   :  { %29 = vsyncpa [#allocation4], 0  ;;  %s3112_s2 = sld [smem:[#allocation10_spill]]  ;;  %v2517_v15 = vmov 0.0   ;;  %vm2518_vm1 = vmmov 0   ;;  %s2519_s5 = smov 80   ;;  %v195_v53 = vlaneseq }
  0x17   :  { %2212 = vmatprep.subr.bf16.mxu0 %v2517_v15  ;;  %2216 = vmatprep.mubr.msk.bf16.mxu0 %vm2518_vm1, %v2517_v15  ;;  %s3113_s29 = sld [smem:[#allocation8_spill]]  ;;  %s2520_s1 = smov 96   ;;  %vm202_vm2 = vcmask 130048   ;;  %vm249_vm3 = vcmask 64512   ;;  %vm267_vm4 = vcmask 1043456   ;;  %vm426_vm5 = vcmask 261248  }
  0x18   :  { %2220 = vmatprep.subr.bf16.mxu1 %v2517_v15  ;;  %2222 = vmatprep.mubr.msk.bf16.mxu1 %vm2518_vm1, %v2517_v15  ;;  %s3114_s4 = sld [smem:[#allocation9_spill]]  ;;  %s2521_s26 = smov 112   ;;  %v196_v56 = vshrl.u32 %v195_v53, 7  ;;  %vm899_vm6 = vcmask 523264   ;;  %vm1856_vm7 = vcmask 1040384   ;;  %vm1993_vm8 = vcmask 17408  }
  0x19   :  { %s3115_s25 = sld [smem:[#allocation11_spill]]  ;;  %s3101_s28 = smov 48  }
  0x1a   :  { %s3116_s7 = sld [smem:[#allocation7_spill]]  ;;  %v197_v58 = vsub.s32 0, %v196_v56  ;;  %s3097_s3 = smov 16  }
  0x1b   :  { %s3117_s30 = sld [smem:[#allocation12_spill]] }
  0x1c   :  { %v2405_v14 = vld [vmem:[%s3112_s2 + $0x8] sm:$0xff]   ;;  %v2406_v16 = vld [vmem:[%s3112_s2] sm:$0xff]   ;;  %s3118_s0 = sld [smem:[#allocation13_spill]] }
  0x1d   :  { %2213 = vmatpush3.bf16.msra.mxu0 %v2405_v14  ;;  %v2047_v25 = vld [vmem:[%s3113_s29] ss:$0 sm:$0xff]  ;;  %s3099_s29 = smov 64  }
  0x1e   :  { %2214 = vmatprep.subr.bf16.mxu0 %v2517_v15  ;;  %v2048_v29 = vld [vmem:[%s3114_s4] ss:$0 sm:$0xff]  ;;  %s2525_s4 = smov [#allocation3]  }
  0x1f   :  { %v2049_v35 = vld [vmem:[%s3115_s25] ss:$0 sm:$0xff]  ;;  %s2035_s24 = sshll.u32 %s2525_s4, 4  ;;  %s2036_s24 = int_to_ptr.vmem [resolvable:$true] %s2035_s24 }
  0x20   :  { %v123_v54 = vld [vmem:[%s3116_s7] sm:$0x3]  ;;  %p2500_p1 = scmp.lt.s32.totalorder %s2036_s24, %s2036_s24 }
  0x21   :  { %2215 = vmatpush3.bf16.msra.mxu0 %v2406_v16  ;;  %v124_v55 = vsub.f32 1.0, %v123_v54 }
  0x22   :  { %2226 = vmatprep.subr.bf16.mxu0 %v2517_v15 }
  0x23   :  { %v125_v57 = vmul.f32 -1e+09, %v124_v55 }
  0x25   :  { %v2730_v59 = vrot.slane %v125_v57, %v197_v58 }
  0x9a   :  { %v82_v4 = vpop.xlane.xlu0 %81 }
  0x9b   :  { %v87_v5 = vmul.f32 0.03125, %v82_v4  ;;  %v430_v4 = vsub.s32 1, %v196_v56 }
  0x9d   :  { %v89_v6 = vsub.f32 %v75_v0, %v87_v5 }
  0x9e   :  { %v85_v7 = vpop.xlane.xlu0 %84 }
  0x9f   :  { %v88_v8 = vmul.f32 0.03125, %v85_v7  ;;  %v91_v9 = vmul.f32 %v89_v6, %v89_v6 }
  0xa1   :  { %v90_v10 = vsub.f32 %v76_v1, %v88_v8  ;;  %v93_v11 = vsel %vm79_vm0, %v91_v9, 0.0  ;;  %v2736_v8 = vrot.slane %v125_v57, %v430_v4 }
  0xa2   :  { %94 = vadd.xlane.f32.xlu1 %v93_v11 }
  0xa3   :  { %v92_v12 = vmul.f32 %v90_v10, %v90_v10 }
  0xa5   :  { %v96_v13 = vsel %vm79_vm0, %v92_v12, 0.0 }
  0xa6   :  { %97 = vadd.xlane.f32.xlu1 %v96_v13 }
 0x12b   :  { %v95_v17 = vpop.xlane.xlu1 %94 }
 0x12c   :  { %v99_v18 = vmul.f32 0.03125, %v95_v17 }
 0x12e   :  { %v101_v19 = vadd.f32 1e-12, %v99_v18 }
 0x12f   :  { %v98_v20 = vpop.xlane.xlu1 %97 }
 0x130   :  { %2429 = vrsqrt.f32 %v101_v19  ;;  %v100_v21 = vmul.f32 0.03125, %v98_v20 }
 0x132   :  { %v102_v22 = vadd.f32 1e-12, %v100_v21 }
 0x134   :  { %2431 = vrsqrt.f32 %v102_v22 }
 0x13d   :  { %v2430_v23 = vpop.eup %2429 }
 0x13e   :  { %v105_v24 = vmul.f32 %v2430_v23, %v89_v6 }
 0x140   :  { %v113_v28 = vmul.f32 %v2047_v25, %v105_v24 }
 0x141   :  { %v2432_v26 = vpop.eup %2431 }
 0x142   :  { %v106_v27 = vmul.f32 %v2432_v26, %v90_v10  ;;  %v2676_v31 = vadd.f32 %v2048_v29, %v113_v28 }
 0x144   :  { %v114_v30 = vmul.f32 %v2047_v25, %v106_v27 }
 0x146   :  { %v2678_v32 = vadd.f32 %v2048_v29, %v114_v30 }
 0x148   :  { %v126_v33 = vpack.c.bf16 %v2678_v32, %v2676_v31 }
 0x14a   :  { %2217 = vmatmul.mubr.msk.bf16.vlgmr.msra.gmra.mxu0 %vm79_vm0, %v126_v33 }
 0x14b   :  { %2228 = vmatprep.mubr.msk.bf16.mxu0 %vm2518_vm1, %v2517_v15 }
 0x20a   :  { %v187_v34 = vpop.f32.mrf.mxu0 }
 0x20b   :  { %v188_v38 = vadd.f32 %v2049_v35, %v187_v34 }
 0x20c   :  { %v2218_v36 = vpop.f32.mrf.mxu0 }
 0x20e   :  { %v190_v37 = vpop.f32.mrf.mxu0 }
 0x20f   :  { %v191_v39 = vadd.f32 %v2049_v35, %v190_v37 }
 0x210   :  { %v2219_v40 = vpop.f32.mrf.mxu0 }
 0x211   :  { %v2688_v41 = vpack.c.bf16 %v191_v39, %v188_v38 }
 0x213   :  { %314 = vrot.lane.b32.xlu1 %v2688_v41, %s2519_s5  ;;  %200 = vrot.lane.b32.xlu0 %v2688_v41, %s2520_s1  ;;  %v2695_v42 = vrot.slane %v2688_v41, 4 }
 0x217   :  { %312 = vrot.lane.b32.xlu1 %v2688_v41, %s2521_s26  ;;  %544 = vrot.lane.b32.xlu0 %v2695_v42, %s2519_s5 }
 0x21b   :  { %433 = vrot.lane.b32.xlu1 %v2695_v42, %s2520_s1 }
 0x21f   :  { %542 = vrot.lane.b32.xlu1 %v2695_v42, %s2521_s26 }
 0x285   :  { %v201_v43 = vpop.permute.xlu0 %200  ;;  %v315_v45 = vpop.permute.xlu1 %314 }
 0x286   :  { %v207_v44 = vsel %vm202_vm2, %v201_v43, 0  ;;  %v320_v47 = vsel %vm202_vm2, %v315_v45, 0 }
 0x287   :  { %2221 = vmatpush3.bf16.xpose.msra.mxu1 %v207_v44 }
 0x288   :  { %2232 = vmatprep.subr.bf16.mxu1 %v2517_v15 }
 0x289   :  { %v313_v46 = vpop.permute.xlu1 %312  ;;  %v545_v50 = vpop.permute.xlu0 %544 }
 0x28a   :  { %v550_v51 = vsel %vm202_vm2, %v545_v50, 0 }
 0x28d   :  { %v434_v48 = vpop.permute.xlu1 %433 }
 0x28e   :  { %2223 = vmatmul.mubr.msk.bf16.vlgmr.msra.gmra.mxu1 %vm202_vm2, %v2688_v41  ;;  %v439_v49 = vsel %vm202_vm2, %v434_v48, 0 }
 0x28f   :  { %2233 = vmatpush3.bf16.xpose.msra.mxu1 %v320_v47  ;;  %2234 = vmatprep.mubr.msk.bf16.mxu1 %vm2518_vm1, %v2517_v15 }
 0x290   :  { %2244 = vmatprep.subr.bf16.mxu1 %v2517_v15 }
 0x291   :  { %v543_v52 = vpop.permute.xlu1 %542 }
 0x296   :  { %2235 = vmatmul.mubr.msk.bf16.vlgmr.msra.gmra.mxu1 %vm202_vm2, %v313_v46 }
 0x297   :  { %2245 = vmatpush3.bf16.xpose.msra.mxu1 %v439_v49  ;;  %2246 = vmatprep.mubr.msk.bf16.mxu1 %vm2518_vm1, %v2517_v15 }
 0x298   :  { %2256 = vmatprep.subr.bf16.mxu1 %v2517_v15 }
 0x29e   :  { %2247 = vmatmul.mubr.msk.bf16.vlgmr.msra.gmra.mxu1 %vm202_vm2, %v2695_v42 }
 0x29f   :  { %2257 = vmatpush3.bf16.xpose.msra.mxu1 %v550_v51  ;;  %2258 = vmatprep.mubr.msk.bf16.mxu1 %vm2518_vm1, %v2517_v15 }
 0x2a0   :  { %2268 = vmatprep.subr.bf16.mxu1 %v2517_v15 }
 0x2a6   :  { %2259 = vmatmul.mubr.msk.bf16.vlgmr.msra.gmra.mxu1 %vm202_vm2, %v543_v52 }
 0x2a7   :  { %2272 = vmatprep.mubr.msk.bf16.mxu1 %vm2518_vm1, %v2517_v15 }
 0x34e   :  { %v243_v60 = vpop.f32.mrf.mxu1 }
 0x34f   :  { %v244_v61 = vadd.f32 %v243_v60, %v2730_v59 }
 0x350   :  { %v2224_v62 = vpop.f32.mrf.mxu1 }
 0x351   :  { %v250_v63 = vsel %vm249_vm3, %v244_v61, -inf }
 0x352   :  { %v246_v0 = vpop.f32.mrf.mxu1  ;;  %251 = vmax.xlane.f32.xlu0 %v250_v63 }
 0x354   :  { %v2225_v1 = vpop.f32.mrf.mxu1 }
 0x356   :  { %v356_v2 = vpop.f32.mrf.mxu1 }
 0x357   :  { %v357_v3 = vadd.f32 %v356_v2, %v2730_v59 }
 0x358   :  { %v2236_v5 = vpop.f32.mrf.mxu1 }
 0x359   :  { %v362_v6 = vsel %vm249_vm3, %v357_v3, -inf }
 0x35a   :  { %v359_v7 = vpop.f32.mrf.mxu1  ;;  %363 = vmax.xlane.f32.xlu1 %v362_v6 }
 0x35c   :  { %v2237_v9 = vpop.f32.mrf.mxu1 }
 0x35e   :  { %v475_v10 = vpop.f32.mrf.mxu1 }
 0x35f   :  { %v476_v11 = vadd.f32 %v475_v10, %v2736_v8 }
 0x360   :  { %v2248_v12 = vpop.f32.mrf.mxu1 }
 0x361   :  { %v481_v13 = vsel %vm249_vm3, %v476_v11, -inf }
 0x362   :  { %482 = vmax.xlane.f32.xlu0 %v481_v13  ;;  %v478_v14 = vpop.f32.mrf.mxu1 }
 0x364   :  { %v2249_v16 = vpop.f32.mrf.mxu1 }
 0x366   :  { %v586_v17 = vpop.f32.mrf.mxu1 }
 0x367   :  { %v587_v18 = vadd.f32 %v586_v17, %v2736_v8 }
 0x368   :  { %v2260_v19 = vpop.f32.mrf.mxu1 }
 0x369   :  { %v592_v20 = vsel %vm249_vm3, %v587_v18, -inf }
 0x36a   :  { %593 = vmax.xlane.f32.xlu0 %v592_v20  ;;  %v589_v21 = vpop.f32.mrf.mxu1  ;;  %v2407_v20 = vld [vmem:[%s3117_s30 + $0x8] sm:$0xff]  }
 0x36b   :  { %2269 = vmatpush3.bf16.msra.mxu1 %v2407_v20  ;;  %v2408_v21 = vld [vmem:[%s3117_s30] sm:$0xff]  }
 0x36c   :  { %v2261_v22 = vpop.f32.mrf.mxu1  ;;  %2270 = vmatprep.subr.bf16.mxu1 %v2517_v15 }
 0x36f   :  { %2271 = vmatpush3.bf16.msra.mxu1 %v2408_v21 }
 0x370   :  { %2284 = vmatprep.subr.bf16.mxu1 %v2517_v15 }
 0x3db   :  { %v252_v23 = vpop.xlane.xlu0 %251 }
 0x3dc   :  { %v253_v24 = vsub.f32 %v244_v61, %v252_v23 }
 0x3de   :  { %v254_v25 = vmul.f32 1.442695, %v253_v24 }
 0x3e0   :  { %2433 = vpow2.f32 %v254_v25 }
 0x3e3   :  { %v364_v26 = vpop.xlane.xlu1 %363 }
 0x3e4   :  { %v365_v27 = vsub.f32 %v357_v3, %v364_v26 }
 0x3e6   :  { %v366_v28 = vmul.f32 1.442695, %v365_v27 }
 0x3e8   :  { %2435 = vpow2.f32 %v366_v28 }
 0x3eb   :  { %v483_v29 = vpop.xlane.xlu0 %482 }
 0x3ec   :  { %v484_v30 = vsub.f32 %v476_v11, %v483_v29 }
 0x3ed   :  { %v2434_v33 = vpop.eup %2433 }
 0x3ee   :  { %v485_v34 = vmul.f32 1.442695, %v484_v30  ;;  %v256_v35 = vsel %vm249_vm3, %v2434_v33, 0.0 }
 0x3ef   :  { %257 = vadd.xlane.f32.xlu0 %v256_v35 }
 0x3f0   :  { %2437 = vpow2.f32 %v485_v34 }
 0x3f3   :  { %v594_v40 = vpop.xlane.xlu0 %593 }
 0x3f4   :  { %v595_v43 = vsub.f32 %v587_v18, %v594_v40 }
 0x3f5   :  { %v2436_v36 = vpop.eup %2435 }
 0x3f6   :  { %v368_v37 = vsel %vm249_vm3, %v2436_v36, 0.0  ;;  %v596_v44 = vmul.f32 1.442695, %v595_v43 }
 0x3f7   :  { %369 = vadd.xlane.f32.xlu1 %v368_v37 }
 0x3f8   :  { %2439 = vpow2.f32 %v596_v44 }
 0x3fd   :  { %v2438_v38 = vpop.eup %2437 }
 0x3fe   :  { %v487_v39 = vsel %vm249_vm3, %v2438_v38, 0.0 }
 0x3ff   :  { %488 = vadd.xlane.f32.xlu0 %v487_v39 }
 0x405   :  { %v2440_v45 = vpop.eup %2439 }
 0x406   :  { %v598_v46 = vsel %vm249_vm3, %v2440_v45, 0.0 }
 0x408   :  { %374 = vrot.lane.b32.xlu1 %v2688_v41, %s3101_s28 }
 0x40c   :  { %493 = vrot.lane.b32.xlu1 %v2695_v42, %s3099_s29 }
 0x415   :  { %262 = vrot.lane.b32.xlu0 %v2688_v41, %s3099_s29 }
 0x430   :  { %599 = vadd.xlane.f32.xlu1 %v598_v46 }
 0x441   :  { %604 = vrot.lane.b32.xlu1 %v2695_v42, %s3101_s28 }
 0x478   :  { %v258_v47 = vpop.xlane.xlu0 %257 }
 0x479   :  { %2441 = vrcp.f32 %v258_v47 }
 0x480   :  { %v370_v48 = vpop.xlane.xlu1 %369 }
 0x481   :  { %2443 = vrcp.f32 %v370_v48 }
 0x484   :  { %v375_v53 = vpop.permute.xlu1 %374 }
 0x485   :  { %v380_v42 = vsel %vm267_vm4, %v375_v53, 0 }
 0x486   :  { %v2442_v49 = vpop.eup %2441 }
 0x487   :  { %v260_v51 = vmul.f32 %v2442_v49, %v2434_v33  ;;  %v2061_v33 = vld [vmem:[%s3118_s0] ss:$0 sm:$0xff] }
 0x488   :  { %v489_v50 = vpop.xlane.xlu0 %488  ;;  %v494_v57 = vpop.permute.xlu1 %493 }
 0x489   :  { %2445 = vrcp.f32 %v489_v50  ;;  %v261_v54 = vpack.c.bf16 %v260_v51, %v260_v51  ;;  %v499_v61 = vsel %vm267_vm4, %v494_v57, 0 }
 0x48c   :  { %v263_v41 = vpop.permute.xlu0 %262 }
 0x48d   :  { %v269_v52 = vsel %vm267_vm4, %v263_v41, 0 }
 0x48e   :  { %2227 = vmatpush3.bf16.msra.mxu0 %v269_v52  ;;  %v2444_v55 = vpop.eup %2443 }
 0x48f   :  { %2238 = vmatprep.subr.bf16.mxu0 %v2517_v15  ;;  %v372_v56 = vmul.f32 %v2444_v55, %v2436_v36 }
 0x491   :  { %2229 = vmatmul.mubr.msk.bf16.vlgmr.msra.gmra.mxu0 %vm249_vm3, %v261_v54  ;;  %v373_v58 = vpack.c.bf16 %v372_v56, %v372_v56  ;;  %v2410_v54 = vld [vmem:[%s3078_s10] sm:$0xff]  }
 0x492   :  { %2239 = vmatpush3.bf16.msra.mxu0 %v380_v42  ;;  %2240 = vmatprep.mubr.msk.bf16.mxu0 %vm2518_vm1, %v2517_v15 }
 0x493   :  { %2250 = vmatprep.subr.bf16.mxu0 %v2517_v15 }
 0x496   :  { %v2446_v60 = vpop.eup %2445 }
 0x497   :  { %v491_v62 = vmul.f32 %v2446_v60, %v2438_v38 }
 0x499   :  { %2241 = vmatmul.mubr.msk.bf16.vlgmr.msra.gmra.mxu0 %vm249_vm3, %v373_v58  ;;  %v492_v63 = vpack.c.bf16 %v491_v62, %v491_v62 }
 0x49a   :  { %2251 = vmatpush3.bf16.msra.mxu0 %v499_v61  ;;  %2252 = vmatprep.mubr.msk.bf16.mxu0 %vm2518_vm1, %v2517_v15 }
 0x49b   :  { %2262 = vmatprep.subr.bf16.mxu0 %v2517_v15 }
 0x4a1   :  { %2253 = vmatmul.mubr.msk.bf16.vlgmr.msra.gmra.mxu0 %vm249_vm3, %v492_v63  ;;  %v2065_v63 = vld [vmem:[%s3076_s8] ss:$0 sm:$0xff] }
 0x4a2   :  { %2264 = vmatprep.mubr.msk.bf16.mxu0 %vm2518_vm1, %v2517_v15 }
 0x4b9   :  { %v600_v0 = vpop.xlane.xlu1 %599 }
 0x4ba   :  { %2447 = vrcp.f32 %v600_v0 }
 0x4bd   :  { %v605_v1 = vpop.permute.xlu1 %604 }
 0x4be   :  { %v610_v2 = vsel %vm267_vm4, %v605_v1, 0 }
 0x4bf   :  { %2263 = vmatpush3.bf16.msra.mxu0 %v610_v2 }
 0x4c0   :  { %2276 = vmatprep.subr.bf16.mxu0 %v2517_v15 }
 0x4c7   :  { %v2448_v3 = vpop.eup %2447 }
 0x4c8   :  { %v602_v4 = vmul.f32 %v2448_v3, %v2440_v45  ;;  %v2066_v3 = vld [vmem:[%s3077_s9] ss:$0 sm:$0xff] }
 0x4ca   :  { %v603_v5 = vpack.c.bf16 %v602_v4, %v602_v4 }
 0x4cc   :  { %2265 = vmatmul.mubr.msk.bf16.vlgmr.msra.gmra.mxu0 %vm249_vm3, %v603_v5 }
 0x4cd   :  { %2280 = vmatprep.mubr.msk.bf16.mxu0 %vm2518_vm1, %v2517_v15 }
 0x551   :  { %v305_v6 = vpop.f32.mrf.mxu0 }
 0x552   :  { %311 = vst.msk [vmem:[#allocation2] sm:$0xff] %vm202_vm2, %v305_v6 }
 0x553   :  { %v2230_v7 = vpop.f32.mrf.mxu0 }
 0x555   :  { %v308_v9 = vpop.f32.mrf.mxu0 }
 0x556   :  { %v2411_v9 = vld [vmem:[%s3080_s12 + $0x18] sm:$0xff]  }
 0x557   :  { %v2231_v10 = vpop.f32.mrf.mxu0 }
 0x558   :  { %v2412_v10 = vld [vmem:[%s3080_s12 + $0x10] sm:$0xff]  }
 0x559   :  { %v416_v11 = vpop.f32.mrf.mxu0 }
 0x55a   :  { %423 = vrot.lane.b32.xlu0 %v416_v11, %s3097_s3  ;;  %v2413_v11 = vld [vmem:[%s3080_s12 + $0x8] sm:$0xff]  }
 0x55b   :  { %v2242_v12 = vpop.f32.mrf.mxu0 }
 0x55c   :  { %v2414_v12 = vld [vmem:[%s3080_s12] sm:$0xff]  }
 0x55d   :  { %v419_v13 = vpop.f32.mrf.mxu0 }
 0x55e   :  { %v2067_v13 = vld [vmem:[%s3079_s11] ss:$0 sm:$0xff] }
 0x55f   :  { %v2243_v14 = vpop.f32.mrf.mxu0 }
 0x561   :  { %v535_v16 = vpop.f32.mrf.mxu0 }
 0x562   :  { %541 = vst.msk [vmem:[#allocation2 + $0x8] sm:$0xff] %vm202_vm2, %v535_v16 }
 0x563   :  { %v2254_v17 = vpop.f32.mrf.mxu0 }
 0x565   :  { %v538_v18 = vpop.f32.mrf.mxu0 }
 0x567   :  { %v2255_v19 = vpop.f32.mrf.mxu0 }
 0x58c   :  { %v646_v22 = vpop.f32.mrf.mxu0 }
 0x58d   :  { %653 = vrot.lane.b32.xlu1 %v646_v22, %s3097_s3 }
 0x58e   :  { %v2266_v23 = vpop.f32.mrf.mxu0 }
 0x590   :  { %v649_v24 = vpop.f32.mrf.mxu0 }
 0x592   :  { %v2267_v25 = vpop.f32.mrf.mxu0 }
 0x5cc   :  { %v424_v26 = vpop.permute.xlu0 %423 }
 0x5cd   :  { %427 = vst.msk [vmem:[#allocation2] sm:$0xff] %vm426_vm5, %v424_v26 }
 0x5d4   :  { %v657_v28 = vld [vmem:[#allocation2] sm:$0xff] }
 0x5ff   :  { %v654_v27 = vpop.permute.xlu1 %653 }
 0x600   :  { %656 = vst.msk [vmem:[#allocation2 + $0x8] sm:$0xff] %vm426_vm5, %v654_v27 }
 0x607   :  { %v658_v29 = vld [vmem:[#allocation2 + $0x8] sm:$0xff] }
 0x608   :  { %v659_v30 = vpack.c.bf16 %v658_v29, %v657_v28 }
 0x60a   :  { %2273 = vmatmul.mubr.msk.bf16.vlgmr.msra.gmra.mxu1 %vm79_vm0, %v659_v30 }
 0x60b   :  { %2292 = vmatprep.mubr.msk.bf16.mxu1 %vm2518_vm1, %v2517_v15  ;;  %2285 = vmatpush3.bf16.msra.mxu1 %v2411_v9  ;;  %v2077_v9 = vld [vmem:[%s3082_s14] ss:$0 sm:$0xff] }
 0x60c   :  { %2286 = vmatprep.subr.bf16.mxu1 %v2517_v15 }
 0x60f   :  { %2287 = vmatpush3.bf16.msra.mxu1 %v2412_v10 }
 0x610   :  { %2288 = vmatprep.subr.bf16.mxu1 %v2517_v15 }
 0x613   :  { %2289 = vmatpush3.bf16.msra.mxu1 %v2413_v11 }
 0x614   :  { %2290 = vmatprep.subr.bf16.mxu1 %v2517_v15 }
 0x617   :  { %2291 = vmatpush3.bf16.msra.mxu1 %v2414_v12 }
 0x618   :  { %2310 = vmatprep.subr.bf16.mxu1 %v2517_v15 }
 0x6ca   :  { %v720_v34 = vpop.f32.mrf.mxu1 }
 0x6cb   :  { %v721_v35 = vadd.f32 %v2061_v33, %v720_v34 }
 0x6cc   :  { %v2274_v36 = vpop.f32.mrf.mxu1 }
 0x6cd   :  { %v727_v37 = vadd.f32 %v721_v35, %v2676_v31 }
 0x6ce   :  { %v723_v38 = vpop.f32.mrf.mxu1 }
 0x6cf   :  { %v724_v39 = vadd.f32 %v2061_v33, %v723_v38  ;;  %v731_v40 = vsel %vm79_vm0, %v727_v37, 0.0 }
 0x6d0   :  { %732 = vadd.xlane.f32.xlu0 %v731_v40  ;;  %v2275_v43 = vpop.f32.mrf.mxu1 }
 0x6d1   :  { %v728_v44 = vadd.f32 %v724_v39, %v2678_v32  ;;  %v2409_v32 = vld [vmem:[%s3078_s10 + $0x8] sm:$0xff]  }
 0x6d2   :  { %2277 = vmatpush3.bf16.msra.mxu0 %v2409_v32 }
 0x6d3   :  { %v734_v45 = vsel %vm79_vm0, %v728_v44, 0.0  ;;  %2278 = vmatprep.subr.bf16.mxu0 %v2517_v15 }
 0x6d4   :  { %735 = vadd.xlane.f32.xlu1 %v734_v45 }
 0x6d6   :  { %2279 = vmatpush3.bf16.msra.mxu0 %v2410_v54 }
 0x6d7   :  { %2296 = vmatprep.subr.bf16.mxu0 %v2517_v15 }
 0x759   :  { %v733_v46 = vpop.xlane.xlu0 %732 }
 0x75a   :  { %v737_v47 = vmul.f32 0.03125, %v733_v46 }
 0x75c   :  { %v739_v48 = vsub.f32 %v727_v37, %v737_v47 }
 0x75d   :  { %v736_v49 = vpop.xlane.xlu1 %735 }
 0x75e   :  { %v738_v50 = vmul.f32 0.03125, %v736_v49  ;;  %v741_v51 = vmul.f32 %v739_v48, %v739_v48 }
 0x760   :  { %v740_v41 = vsub.f32 %v728_v44, %v738_v50  ;;  %v743_v31 = vsel %vm79_vm0, %v741_v51, 0.0  ;;  %v2071_v44 = vld [vmem:[%s3081_s13] ss:$0 sm:$0xff] }
 0x761   :  { %744 = vadd.xlane.f32.xlu0 %v743_v31 }
 0x762   :  { %v742_v52 = vmul.f32 %v740_v41, %v740_v41 }
 0x764   :  { %v746_v53 = vsel %vm79_vm0, %v742_v52, 0.0 }
 0x765   :  { %747 = vadd.xlane.f32.xlu0 %v746_v53 }
 0x7ea   :  { %v745_v55 = vpop.xlane.xlu0 %744 }
 0x7eb   :  { %v749_v42 = vmul.f32 0.03125, %v745_v55 }
 0x7ed   :  { %v751_v56 = vadd.f32 1e-12, %v749_v42 }
 0x7ee   :  { %v748_v57 = vpop.xlane.xlu0 %747 }
 0x7ef   :  { %2449 = vrsqrt.f32 %v751_v56  ;;  %v750_v58 = vmul.f32 0.03125, %v748_v57 }
 0x7f1   :  { %v752_v60 = vadd.f32 1e-12, %v750_v58 }
 0x7f3   :  { %2451 = vrsqrt.f32 %v752_v60 }
 0x7fc   :  { %v2450_v61 = vpop.eup %2449 }
 0x7fd   :  { %v755_v62 = vmul.f32 %v2450_v61, %v739_v48 }
 0x7ff   :  { %v763_v2 = vmul.f32 %v2065_v63, %v755_v62  ;;  %v2415_v62 = vld [vmem:[%s3112_s2 + $0x18] sm:$0xff]  }
 0x800   :  { %v2452_v0 = vpop.eup %2451 }
 0x801   :  { %v756_v1 = vmul.f32 %v2452_v0, %v740_v41  ;;  %v771_v5 = vadd.f32 %v2066_v3, %v763_v2 }
 0x803   :  { %v764_v4 = vmul.f32 %v2065_v63, %v756_v1  ;;  %v2416_v63 = vld [vmem:[%s3112_s2 + $0x10] sm:$0xff]  }
 0x805   :  { %v772_v6 = vadd.f32 %v2066_v3, %v764_v4 }
 0x807   :  { %v773_v7 = vpack.c.bf16 %v772_v6, %v771_v5 }
 0x809   :  { %2281 = vmatmul.mubr.msk.bf16.vlgmr.msra.gmra.mxu0 %vm79_vm0, %v773_v7 }
 0x80a   :  { %2300 = vmatprep.mubr.msk.bf16.mxu0 %vm2518_vm1, %v2517_v15  ;;  %2297 = vmatpush3.bf16.msra.mxu0 %v2415_v62 }
 0x80b   :  { %2298 = vmatprep.subr.bf16.mxu0 %v2517_v15 }
 0x80e   :  { %2299 = vmatpush3.bf16.msra.mxu0 %v2416_v63 }
 0x80f   :  { %2304 = vmatprep.subr.bf16.mxu0 %v2517_v15 }
 0x8c9   :  { %v834_v14 = vpop.f32.mrf.mxu0 }
 0x8ca   :  { %v835_v16 = vadd.f32 %v2067_v13, %v834_v14 }
 0x8cb   :  { %v2282_v17 = vpop.f32.mrf.mxu0 }
 0x8cc   :  { %v843_v18 = vmul.f32 0.044715, %v835_v16  ;;  %v841_v36 = vmul.f32 0.5, %v835_v16 }
 0x8cd   :  { %v837_v19 = vpop.f32.mrf.mxu0 }
 0x8ce   :  { %v845_v20 = vmul.f32 %v843_v18, %v835_v16  ;;  %v838_v21 = vadd.f32 %v2067_v13, %v837_v19  ;;  %v2078_v13 = vld [vmem:[%s3083_s15] ss:$0 sm:$0xff] }
 0x8cf   :  { %v2283_v22 = vpop.f32.mrf.mxu0 }
 0x8d0   :  { %v847_v23 = vmul.f32 %v845_v20, %v835_v16  ;;  %v844_v24 = vmul.f32 0.044715, %v838_v21  ;;  %v842_v37 = vmul.f32 0.5, %v838_v21  ;;  %v2084_v20 = vld [vmem:[%s3115_s25 + $0x1] ss:$0 sm:$0xff]  ;;  %s3119_s25 = smov 48  }
 0x8d2   :  { %v849_v25 = vadd.f32 %v847_v23, %v835_v16  ;;  %v846_v26 = vmul.f32 %v844_v24, %v838_v21 }
 0x8d4   :  { %v851_v27 = vmul.f32 0.7978846, %v849_v25  ;;  %v848_v28 = vmul.f32 %v846_v26, %v838_v21 }
 0x8d6   :  { %2453 = vtanh.f32 %v851_v27  ;;  %v850_v29 = vadd.f32 %v848_v28, %v838_v21 }
 0x8d8   :  { %v852_v30 = vmul.f32 0.7978846, %v850_v29 }
 0x8da   :  { %2455 = vtanh.f32 %v852_v30 }
 0x8e3   :  { %v2454_v33 = vpop.eup %2453 }
 0x8e4   :  { %v855_v34 = vadd.f32 1.0, %v2454_v33 }
 0x8e6   :  { %v857_v39 = vmul.f32 %v855_v34, %v841_v36 }
 0x8e7   :  { %v2456_v35 = vpop.eup %2455 }
 0x8e8   :  { %v856_v38 = vadd.f32 1.0, %v2456_v35 }
 0x8ea   :  { %v858_v40 = vmul.f32 %v856_v38, %v842_v37 }
 0x8ec   :  { %v859_v43 = vpack.c.bf16 %v858_v40, %v857_v39 }
 0x8ee   :  { %2293 = vmatmul.mubr.msk.bf16.vlgmr.msra.gmra.mxu1 %vm899_vm6, %v859_v43 }
 0x8ef   :  { %2312 = vmatprep.mubr.msk.bf16.mxu1 %vm2518_vm1, %v2517_v15 }
 0x9ae   :  { %v937_v45 = vpop.f32.mrf.mxu1 }
 0x9af   :  { %v938_v46 = vadd.f32 %v2071_v44, %v937_v45 }
 0x9b0   :  { %v2294_v47 = vpop.f32.mrf.mxu1 }
 0x9b1   :  { %v944_v48 = vadd.f32 %v938_v46, %v771_v5 }
 0x9b2   :  { %v940_v49 = vpop.f32.mrf.mxu1 }
 0x9b3   :  { %v941_v50 = vadd.f32 %v2071_v44, %v940_v49  ;;  %v948_v51 = vsel %vm79_vm0, %v944_v48, 0.0 }
 0x9b4   :  { %949 = vadd.xlane.f32.xlu0 %v948_v51  ;;  %v2295_v41 = vpop.f32.mrf.mxu1 }
 0x9b5   :  { %v945_v31 = vadd.f32 %v941_v50, %v772_v6 }
 0x9b7   :  { %v951_v52 = vsel %vm79_vm0, %v945_v31, 0.0 }
 0x9b8   :  { %952 = vadd.xlane.f32.xlu1 %v951_v52 }
 0xa3d   :  { %v950_v53 = vpop.xlane.xlu0 %949 }
 0xa3e   :  { %v954_v32 = vmul.f32 0.03125, %v950_v53 }
 0xa40   :  { %v956_v54 = vsub.f32 %v944_v48, %v954_v32 }
 0xa41   :  { %v953_v55 = vpop.xlane.xlu1 %952 }
 0xa42   :  { %v955_v42 = vmul.f32 0.03125, %v953_v55  ;;  %v958_v56 = vmul.f32 %v956_v54, %v956_v54 }
 0xa44   :  { %v957_v57 = vsub.f32 %v945_v31, %v955_v42  ;;  %v960_v58 = vsel %vm79_vm0, %v958_v56, 0.0 }
 0xa45   :  { %961 = vadd.xlane.f32.xlu0 %v960_v58 }
 0xa46   :  { %v959_v60 = vmul.f32 %v957_v57, %v957_v57 }
 0xa48   :  { %v963_v61 = vsel %vm79_vm0, %v959_v60, 0.0 }
 0xa49   :  { %964 = vadd.xlane.f32.xlu1 %v963_v61 }
 0xace   :  { %v962_v0 = vpop.xlane.xlu0 %961 }
 0xacf   :  { %v966_v1 = vmul.f32 0.03125, %v962_v0 }
 0xad1   :  { %v968_v2 = vadd.f32 1e-12, %v966_v1 }
 0xad2   :  { %v965_v3 = vpop.xlane.xlu1 %964 }
 0xad3   :  { %2457 = vrsqrt.f32 %v968_v2  ;;  %v967_v4 = vmul.f32 0.03125, %v965_v3 }
 0xad5   :  { %v969_v5 = vadd.f32 1e-12, %v967_v4 }
 0xad7   :  { %2459 = vrsqrt.f32 %v969_v5 }
 0xae0   :  { %v2458_v6 = vpop.eup %2457 }
 0xae1   :  { %v972_v7 = vmul.f32 %v2458_v6, %v956_v54 }
 0xae3   :  { %v980_v12 = vmul.f32 %v2077_v9, %v972_v7 }
 0xae4   :  { %v2460_v10 = vpop.eup %2459 }
 0xae5   :  { %v973_v11 = vmul.f32 %v2460_v10, %v957_v57  ;;  %v2860_v16 = vadd.f32 %v2078_v13, %v980_v12 }
 0xae7   :  { %v981_v14 = vmul.f32 %v2077_v9, %v973_v11 }
 0xae9   :  { %v2862_v17 = vadd.f32 %v2078_v13, %v981_v14 }
 0xaeb   :  { %v990_v18 = vpack.c.bf16 %v2862_v17, %v2860_v16 }
 0xaed   :  { %2301 = vmatmul.mubr.msk.bf16.vlgmr.msra.gmra.mxu0 %vm79_vm0, %v990_v18 }
 0xaee   :  { %2306 = vmatprep.mubr.msk.bf16.mxu0 %vm2518_vm1, %v2517_v15 }
 0xbad   :  { %v1053_v19 = vpop.f32.mrf.mxu0 }
 0xbae   :  { %v1054_v23 = vadd.f32 %v2084_v20, %v1053_v19 }
 0xbaf   :  { %v2302_v21 = vpop.f32.mrf.mxu0 }
 0xbb1   :  { %v1056_v22 = vpop.f32.mrf.mxu0 }
 0xbb2   :  { %v1057_v24 = vadd.f32 %v2084_v20, %v1056_v22 }
 0xbb3   :  { %v2303_v25 = vpop.f32.mrf.mxu0 }
 0xbb4   :  { %v2872_v26 = vpack.c.bf16 %v1057_v24, %v1054_v23 }
 0xbb6   :  { %1173 = vrot.lane.b32.xlu1 %v2872_v26, %s2519_s5  ;;  %1062 = vrot.lane.b32.xlu0 %v2872_v26, %s2520_s1  ;;  %v2879_v27 = vrot.slane %v2872_v26, 4 }
 0xbba   :  { %1171 = vrot.lane.b32.xlu1 %v2872_v26, %s2521_s26  ;;  %1398 = vrot.lane.b32.xlu0 %v2879_v27, %s2519_s5  ;;  %s3120_s5 = smov 64  }
 0xbbe   :  { %1287 = vrot.lane.b32.xlu1 %v2879_v27, %s2520_s1  ;;  %s3121_s1 = smov 16  }
 0xbc2   :  { %1396 = vrot.lane.b32.xlu1 %v2879_v27, %s2521_s26 }
 0xc28   :  { %v1063_v28 = vpop.permute.xlu0 %1062  ;;  %v1174_v30 = vpop.permute.xlu1 %1173 }
 0xc29   :  { %v1068_v29 = vsel %vm202_vm2, %v1063_v28, 0  ;;  %v1179_v34 = vsel %vm202_vm2, %v1174_v30, 0 }
 0xc2a   :  { %2305 = vmatpush3.bf16.xpose.msra.mxu0 %v1068_v29 }
 0xc2b   :  { %2316 = vmatprep.subr.bf16.mxu0 %v2517_v15 }
 0xc2c   :  { %v1172_v33 = vpop.permute.xlu1 %1171  ;;  %v1399_v37 = vpop.permute.xlu0 %1398 }
 0xc2d   :  { %v1404_v38 = vsel %vm202_vm2, %v1399_v37, 0 }
 0xc30   :  { %v1288_v35 = vpop.permute.xlu1 %1287 }
 0xc31   :  { %2307 = vmatmul.mubr.msk.bf16.vlgmr.msra.gmra.mxu0 %vm202_vm2, %v2872_v26  ;;  %v1293_v36 = vsel %vm202_vm2, %v1288_v35, 0 }
 0xc32   :  { %2317 = vmatpush3.bf16.xpose.msra.mxu0 %v1179_v34  ;;  %2318 = vmatprep.mubr.msk.bf16.mxu0 %vm2518_vm1, %v2517_v15 }
 0xc33   :  { %2328 = vmatprep.subr.bf16.mxu0 %v2517_v15 }
 0xc34   :  { %v1397_v39 = vpop.permute.xlu1 %1396 }
 0xc39   :  { %2319 = vmatmul.mubr.msk.bf16.vlgmr.msra.gmra.mxu0 %vm202_vm2, %v1172_v33 }
 0xc3a   :  { %2329 = vmatpush3.bf16.xpose.msra.mxu0 %v1293_v36  ;;  %2330 = vmatprep.mubr.msk.bf16.mxu0 %vm2518_vm1, %v2517_v15 }
 0xc3b   :  { %2340 = vmatprep.subr.bf16.mxu0 %v2517_v15 }
 0xc41   :  { %2331 = vmatmul.mubr.msk.bf16.vlgmr.msra.gmra.mxu0 %vm202_vm2, %v2879_v27 }
 0xc42   :  { %2341 = vmatpush3.bf16.xpose.msra.mxu0 %v1404_v38  ;;  %2342 = vmatprep.mubr.msk.bf16.mxu0 %vm2518_vm1, %v2517_v15 }
 0xc43   :  { %2352 = vmatprep.subr.bf16.mxu0 %v2517_v15 }
 0xc49   :  { %2343 = vmatmul.mubr.msk.bf16.vlgmr.msra.gmra.mxu0 %vm202_vm2, %v1397_v39 }
 0xc4a   :  { %2356 = vmatprep.mubr.msk.bf16.mxu0 %vm2518_vm1, %v2517_v15 }
 0xcf1   :  { %v1104_v40 = vpop.f32.mrf.mxu0 }
 0xcf2   :  { %v1105_v43 = vadd.f32 %v1104_v40, %v2730_v59 }
 0xcf3   :  { %v2308_v44 = vpop.f32.mrf.mxu0 }
 0xcf4   :  { %v1110_v45 = vsel %vm249_vm3, %v1105_v43, -inf }
 0xcf5   :  { %1111 = vmax.xlane.f32.xlu0 %v1110_v45  ;;  %v1107_v46 = vpop.f32.mrf.mxu0 }
 0xcf7   :  { %v2309_v47 = vpop.f32.mrf.mxu0 }
 0xcf9   :  { %v1215_v48 = vpop.f32.mrf.mxu0 }
 0xcfa   :  { %v1216_v49 = vadd.f32 %v1215_v48, %v2730_v59 }
 0xcfb   :  { %v2320_v50 = vpop.f32.mrf.mxu0 }
 0xcfc   :  { %v1221_v51 = vsel %vm249_vm3, %v1216_v49, -inf }
 0xcfd   :  { %1222 = vmax.xlane.f32.xlu1 %v1221_v51  ;;  %v1218_v41 = vpop.f32.mrf.mxu0 }
 0xcff   :  { %v2321_v31 = vpop.f32.mrf.mxu0 }
 0xd01   :  { %v1329_v52 = vpop.f32.mrf.mxu0 }
 0xd02   :  { %v1330_v53 = vadd.f32 %v1329_v52, %v2736_v8 }
 0xd03   :  { %v2332_v32 = vpop.f32.mrf.mxu0 }
 0xd04   :  { %v1335_v54 = vsel %vm249_vm3, %v1330_v53, -inf }
 0xd05   :  { %1336 = vmax.xlane.f32.xlu0 %v1335_v54  ;;  %v1332_v55 = vpop.f32.mrf.mxu0 }
 0xd07   :  { %v2333_v42 = vpop.f32.mrf.mxu0 }
 0xd09   :  { %v1440_v56 = vpop.f32.mrf.mxu0 }
 0xd0a   :  { %v1441_v57 = vadd.f32 %v1440_v56, %v2736_v8 }
 0xd0b   :  { %v2344_v58 = vpop.f32.mrf.mxu0 }
 0xd0c   :  { %v1446_v59 = vsel %vm249_vm3, %v1441_v57, -inf  ;;  %v2418_v58 = vld [vmem:[%s3117_s30 + $0x10] sm:$0xff]  }
 0xd0d   :  { %1447 = vmax.xlane.f32.xlu0 %v1446_v59  ;;  %v1443_v60 = vpop.f32.mrf.mxu0 }
 0xd0f   :  { %v2345_v61 = vpop.f32.mrf.mxu0 }
 0xd7e   :  { %v1112_v62 = vpop.xlane.xlu0 %1111 }
 0xd7f   :  { %v1113_v63 = vsub.f32 %v1105_v43, %v1112_v62 }
 0xd81   :  { %v1114_v0 = vmul.f32 1.442695, %v1113_v63 }
 0xd83   :  { %2461 = vpow2.f32 %v1114_v0 }
 0xd86   :  { %v1223_v1 = vpop.xlane.xlu1 %1222 }
 0xd87   :  { %v1224_v2 = vsub.f32 %v1216_v49, %v1223_v1 }
 0xd89   :  { %v1225_v3 = vmul.f32 1.442695, %v1224_v2 }
 0xd8b   :  { %2463 = vpow2.f32 %v1225_v3 }
 0xd8e   :  { %v1337_v4 = vpop.xlane.xlu0 %1336 }
 0xd8f   :  { %v1338_v5 = vsub.f32 %v1330_v53, %v1337_v4  ;;  %v2101_v4 = vld [vmem:[%s3118_s0 + $0x1] ss:$0 sm:$0xff] }
 0xd90   :  { %v2462_v6 = vpop.eup %2461 }
 0xd91   :  { %v1339_v7 = vmul.f32 1.442695, %v1338_v5  ;;  %v1116_v8 = vsel %vm249_vm3, %v2462_v6, 0.0 }
 0xd92   :  { %1117 = vadd.xlane.f32.xlu0 %v1116_v8 }
 0xd93   :  { %2465 = vpow2.f32 %v1339_v7 }
 0xd96   :  { %v1448_v13 = vpop.xlane.xlu0 %1447 }
 0xd97   :  { %v1449_v14 = vsub.f32 %v1441_v57, %v1448_v13  ;;  %v2417_v57 = vld [vmem:[%s3117_s30 + $0x18] sm:$0xff]  }
 0xd98   :  { %v2464_v9 = vpop.eup %2463  ;;  %2353 = vmatpush3.bf16.msra.mxu0 %v2417_v57 }
 0xd99   :  { %v1227_v10 = vsel %vm249_vm3, %v2464_v9, 0.0  ;;  %v1450_v18 = vmul.f32 1.442695, %v1449_v14  ;;  %2354 = vmatprep.subr.bf16.mxu0 %v2517_v15 }
 0xd9a   :  { %1228 = vadd.xlane.f32.xlu1 %v1227_v10 }
 0xd9b   :  { %2467 = vpow2.f32 %v1450_v18 }
 0xd9c   :  { %2355 = vmatpush3.bf16.msra.mxu0 %v2418_v58 }
 0xd9d   :  { %2368 = vmatprep.subr.bf16.mxu0 %v2517_v15 }
 0xda0   :  { %v2466_v11 = vpop.eup %2465 }
 0xda1   :  { %v1341_v12 = vsel %vm249_vm3, %v2466_v11, 0.0 }
 0xda2   :  { %1342 = vadd.xlane.f32.xlu0 %v1341_v12 }
 0xda8   :  { %v2468_v19 = vpop.eup %2467 }
 0xda9   :  { %v1452_v20 = vsel %vm249_vm3, %v2468_v19, 0.0 }
 0xdab   :  { %1233 = vrot.lane.b32.xlu1 %v2872_v26, %s3119_s25 }
 0xdaf   :  { %1347 = vrot.lane.b32.xlu1 %v2879_v27, %s3120_s5 }
 0xdb8   :  { %1122 = vrot.lane.b32.xlu0 %v2872_v26, %s3120_s5 }
 0xdd3   :  { %1453 = vadd.xlane.f32.xlu1 %v1452_v20 }
 0xde4   :  { %1458 = vrot.lane.b32.xlu1 %v2879_v27, %s3119_s25 }
 0xe1b   :  { %v1118_v21 = vpop.xlane.xlu0 %1117 }
 0xe1c   :  { %2469 = vrcp.f32 %v1118_v21 }
 0xe23   :  { %v1229_v22 = vpop.xlane.xlu1 %1228 }
 0xe24   :  { %2471 = vrcp.f32 %v1229_v22 }
 0xe27   :  { %v1234_v29 = vpop.permute.xlu1 %1233 }
 0xe28   :  { %v1239_v34 = vsel %vm267_vm4, %v1234_v29, 0 }
 0xe29   :  { %v2470_v23 = vpop.eup %2469 }
 0xe2a   :  { %v1120_v25 = vmul.f32 %v2470_v23, %v2462_v6 }
 0xe2b   :  { %v1343_v24 = vpop.xlane.xlu0 %1342  ;;  %v1348_v35 = vpop.permute.xlu1 %1347 }
 0xe2c   :  { %2473 = vrcp.f32 %v1343_v24  ;;  %v1121_v30 = vpack.c.bf16 %v1120_v25, %v1120_v25  ;;  %v1353_v38 = vsel %vm267_vm4, %v1348_v35, 0 }
 0xe2f   :  { %v1123_v28 = vpop.permute.xlu0 %1122 }
 0xe30   :  { %v1128_v26 = vsel %vm267_vm4, %v1123_v28, 0 }
 0xe31   :  { %2311 = vmatpush3.bf16.msra.mxu1 %v1128_v26  ;;  %v2472_v33 = vpop.eup %2471  ;;  %v2420_v26 = vld [vmem:[%s3078_s10 + $0x10] sm:$0xff]  }
 0xe32   :  { %2322 = vmatprep.subr.bf16.mxu1 %v2517_v15  ;;  %v1231_v27 = vmul.f32 %v2472_v33, %v2464_v9 }
 0xe34   :  { %2313 = vmatmul.mubr.msk.bf16.vlgmr.msra.gmra.mxu1 %vm249_vm3, %v1121_v30  ;;  %v1232_v36 = vpack.c.bf16 %v1231_v27, %v1231_v27 }
 0xe35   :  { %2323 = vmatpush3.bf16.msra.mxu1 %v1239_v34  ;;  %2324 = vmatprep.mubr.msk.bf16.mxu1 %vm2518_vm1, %v2517_v15 }
 0xe36   :  { %2334 = vmatprep.subr.bf16.mxu1 %v2517_v15 }
 0xe39   :  { %v2474_v37 = vpop.eup %2473 }
 0xe3a   :  { %v1345_v39 = vmul.f32 %v2474_v37, %v2466_v11 }
 0xe3c   :  { %2325 = vmatmul.mubr.msk.bf16.vlgmr.msra.gmra.mxu1 %vm249_vm3, %v1232_v36  ;;  %v1346_v40 = vpack.c.bf16 %v1345_v39, %v1345_v39 }
 0xe3d   :  { %2335 = vmatpush3.bf16.msra.mxu1 %v1353_v38  ;;  %2336 = vmatprep.mubr.msk.bf16.mxu1 %vm2518_vm1, %v2517_v15  ;;  %v2107_v38 = vld [vmem:[%s3076_s8 + $0x1] ss:$0 sm:$0xff] }
 0xe3e   :  { %2346 = vmatprep.subr.bf16.mxu1 %v2517_v15 }
 0xe44   :  { %2337 = vmatmul.mubr.msk.bf16.vlgmr.msra.gmra.mxu1 %vm249_vm3, %v1346_v40 }
 0xe45   :  { %2348 = vmatprep.mubr.msk.bf16.mxu1 %vm2518_vm1, %v2517_v15 }
 0xe5c   :  { %v1454_v43 = vpop.xlane.xlu1 %1453 }
 0xe5d   :  { %2475 = vrcp.f32 %v1454_v43 }
 0xe60   :  { %v1459_v44 = vpop.permute.xlu1 %1458 }
 0xe61   :  { %v1464_v45 = vsel %vm267_vm4, %v1459_v44, 0  ;;  %v2108_v44 = vld [vmem:[%s3077_s9 + $0x1] ss:$0 sm:$0xff] }
 0xe62   :  { %2347 = vmatpush3.bf16.msra.mxu1 %v1464_v45 }
 0xe63   :  { %2360 = vmatprep.subr.bf16.mxu1 %v2517_v15 }
 0xe6a   :  { %v2476_v46 = vpop.eup %2475 }
 0xe6b   :  { %v1456_v47 = vmul.f32 %v2476_v46, %v2468_v19 }
 0xe6d   :  { %v1457_v48 = vpack.c.bf16 %v1456_v47, %v1456_v47 }
 0xe6f   :  { %2349 = vmatmul.mubr.msk.bf16.vlgmr.msra.gmra.mxu1 %vm249_vm3, %v1457_v48 }
 0xe70   :  { %2364 = vmatprep.mubr.msk.bf16.mxu1 %vm2518_vm1, %v2517_v15 }
 0xef4   :  { %v1164_v49 = vpop.f32.mrf.mxu1 }
 0xef5   :  { %1170 = vst.msk [vmem:[#allocation2] sm:$0xff] %vm202_vm2, %v1164_v49  ;;  %v2421_v49 = vld [vmem:[%s3080_s12 + $0x38] sm:$0xff]  }
 0xef6   :  { %v2314_v50 = vpop.f32.mrf.mxu1 }
 0xef7   :  { %v2422_v50 = vld [vmem:[%s3080_s12 + $0x30] sm:$0xff]  }
 0xef8   :  { %v1167_v51 = vpop.f32.mrf.mxu1 }
 0xef9   :  { %v2423_v51 = vld [vmem:[%s3080_s12 + $0x28] sm:$0xff]  }
 0xefa   :  { %v2315_v41 = vpop.f32.mrf.mxu1 }
 0xefb   :  { %v2424_v41 = vld [vmem:[%s3080_s12 + $0x20] sm:$0xff]  }
 0xefc   :  { %v1275_v31 = vpop.f32.mrf.mxu1 }
 0xefd   :  { %1282 = vrot.lane.b32.xlu0 %v1275_v31, %s3121_s1  ;;  %v2114_v31 = vld [vmem:[%s3079_s11 + $0x1] ss:$0 sm:$0xff] }
 0xefe   :  { %v2326_v52 = vpop.f32.mrf.mxu1 }
 0xf00   :  { %v1278_v53 = vpop.f32.mrf.mxu1 }
 0xf02   :  { %v2327_v32 = vpop.f32.mrf.mxu1 }
 0xf04   :  { %v1389_v54 = vpop.f32.mrf.mxu1 }
 0xf05   :  { %1395 = vst.msk [vmem:[#allocation2 + $0x8] sm:$0xff] %vm202_vm2, %v1389_v54 }
 0xf06   :  { %v2338_v55 = vpop.f32.mrf.mxu1 }
 0xf08   :  { %v1392_v42 = vpop.f32.mrf.mxu1 }
 0xf0a   :  { %v2339_v56 = vpop.f32.mrf.mxu1 }
 0xf2f   :  { %v1500_v59 = vpop.f32.mrf.mxu1 }
 0xf30   :  { %1507 = vrot.lane.b32.xlu1 %v1500_v59, %s3121_s1 }
 0xf31   :  { %v2350_v60 = vpop.f32.mrf.mxu1 }
 0xf33   :  { %v1503_v61 = vpop.f32.mrf.mxu1 }
 0xf35   :  { %v2351_v62 = vpop.f32.mrf.mxu1 }
 0xf6f   :  { %v1283_v63 = vpop.permute.xlu0 %1282 }
 0xf70   :  { %1285 = vst.msk [vmem:[#allocation2] sm:$0xff] %vm426_vm5, %v1283_v63 }
 0xf77   :  { %v1511_v1 = vld [vmem:[#allocation2] sm:$0xff] }
 0xfa2   :  { %v1508_v0 = vpop.permute.xlu1 %1507 }
 0xfa3   :  { %1510 = vst.msk [vmem:[#allocation2 + $0x8] sm:$0xff] %vm426_vm5, %v1508_v0 }
 0xfaa   :  { %v1512_v2 = vld [vmem:[#allocation2 + $0x8] sm:$0xff] }
 0xfab   :  { %v1513_v3 = vpack.c.bf16 %v1512_v2, %v1511_v1 }
 0xfad   :  { %2357 = vmatmul.mubr.msk.bf16.vlgmr.msra.gmra.mxu0 %vm79_vm0, %v1513_v3 }
 0xfae   :  { %2376 = vmatprep.mubr.msk.bf16.mxu0 %vm2518_vm1, %v2517_v15  ;;  %2369 = vmatpush3.bf16.msra.mxu0 %v2421_v49 }
 0xfaf   :  { %2370 = vmatprep.subr.bf16.mxu0 %v2517_v15 }
 0xfb2   :  { %2371 = vmatpush3.bf16.msra.mxu0 %v2422_v50 }
 0xfb3   :  { %2372 = vmatprep.subr.bf16.mxu0 %v2517_v15 }
 0xfb6   :  { %2373 = vmatpush3.bf16.msra.mxu0 %v2423_v51 }
 0xfb7   :  { %2374 = vmatprep.subr.bf16.mxu0 %v2517_v15 }
 0xfba   :  { %2375 = vmatpush3.bf16.msra.mxu0 %v2424_v41  ;;  %v2136_v41 = vld [vmem:[%s3083_s15 + $0x1] ss:$0 sm:$0xff] }
0x106d   :  { %v1576_v5 = vpop.f32.mrf.mxu0 }
0x106e   :  { %v1577_v6 = vadd.f32 %v2101_v4, %v1576_v5 }
0x106f   :  { %v2358_v7 = vpop.f32.mrf.mxu0 }
0x1070   :  { %v1583_v8 = vadd.f32 %v1577_v6, %v2860_v16 }
0x1071   :  { %v1579_v9 = vpop.f32.mrf.mxu0 }
0x1072   :  { %v1580_v10 = vadd.f32 %v2101_v4, %v1579_v9  ;;  %v1589_v11 = vsel %vm79_vm0, %v1583_v8, 0.0 }
0x1073   :  { %1590 = vadd.xlane.f32.xlu0 %v1589_v11  ;;  %v2359_v12 = vpop.f32.mrf.mxu0  ;;  %v2127_v11 = vld [vmem:[%s3081_s13 + $0x1] ss:$0 sm:$0xff] }
0x1074   :  { %v1584_v13 = vadd.f32 %v1580_v10, %v2862_v17  ;;  %v2419_v17 = vld [vmem:[%s3078_s10 + $0x18] sm:$0xff]  }
0x1075   :  { %2361 = vmatpush3.bf16.msra.mxu1 %v2419_v17 }
0x1076   :  { %v1592_v14 = vsel %vm79_vm0, %v1584_v13, 0.0  ;;  %2362 = vmatprep.subr.bf16.mxu1 %v2517_v15 }
0x1077   :  { %1593 = vadd.xlane.f32.xlu1 %v1592_v14 }
0x1079   :  { %2363 = vmatpush3.bf16.msra.mxu1 %v2420_v26 }
0x107a   :  { %2380 = vmatprep.subr.bf16.mxu1 %v2517_v15 }
0x10fc   :  { %v1591_v18 = vpop.xlane.xlu0 %1590 }
0x10fd   :  { %v1595_v19 = vmul.f32 0.03125, %v1591_v18 }
0x10ff   :  { %v1597_v20 = vsub.f32 %v1583_v8, %v1595_v19 }
0x1100   :  { %v1594_v21 = vpop.xlane.xlu1 %1593 }
0x1101   :  { %v1596_v22 = vmul.f32 0.03125, %v1594_v21  ;;  %v1599_v23 = vmul.f32 %v1597_v20, %v1597_v20 }
0x1103   :  { %v1598_v24 = vsub.f32 %v1584_v13, %v1596_v22  ;;  %v1601_v16 = vsel %vm79_vm0, %v1599_v23, 0.0 }
0x1104   :  { %1602 = vadd.xlane.f32.xlu0 %v1601_v16 }
0x1105   :  { %v1600_v25 = vmul.f32 %v1598_v24, %v1598_v24 }
0x1107   :  { %v1604_v28 = vsel %vm79_vm0, %v1600_v25, 0.0 }
0x1108   :  { %1605 = vadd.xlane.f32.xlu0 %v1604_v28 }
0x118d   :  { %v1603_v29 = vpop.xlane.xlu0 %1602 }
0x118e   :  { %v1607_v30 = vmul.f32 0.03125, %v1603_v29 }
0x1190   :  { %v1609_v33 = vadd.f32 1e-12, %v1607_v30 }
0x1191   :  { %v1606_v34 = vpop.xlane.xlu0 %1605 }
0x1192   :  { %2477 = vrsqrt.f32 %v1609_v33  ;;  %v1608_v27 = vmul.f32 0.03125, %v1606_v34 }
0x1194   :  { %v1610_v35 = vadd.f32 1e-12, %v1608_v27 }
0x1196   :  { %2479 = vrsqrt.f32 %v1610_v35  ;;  %v2425_v35 = vld [vmem:[%s3084_s16 + $0x8] sm:$0xff]  }
0x119f   :  { %v2478_v36 = vpop.eup %2477 }
0x11a0   :  { %v1613_v37 = vmul.f32 %v2478_v36, %v1597_v20  ;;  %v2426_v36 = vld [vmem:[%s3084_s16] sm:$0xff]  }
0x11a2   :  { %v1621_v43 = vmul.f32 %v2107_v38, %v1613_v37 }
0x11a3   :  { %v2480_v39 = vpop.eup %2479 }
0x11a4   :  { %v1614_v40 = vmul.f32 %v2480_v39, %v1598_v24  ;;  %v1629_v46 = vadd.f32 %v2108_v44, %v1621_v43 }
0x11a6   :  { %v1622_v45 = vmul.f32 %v2107_v38, %v1614_v40 }
0x11a8   :  { %v1630_v47 = vadd.f32 %v2108_v44, %v1622_v45 }
0x11aa   :  { %v1631_v48 = vpack.c.bf16 %v1630_v47, %v1629_v46 }
0x11ac   :  { %2365 = vmatmul.mubr.msk.bf16.vlgmr.msra.gmra.mxu1 %vm79_vm0, %v1631_v48  ;;  %v2135_v48 = vld [vmem:[%s3082_s14 + $0x1] ss:$0 sm:$0xff] }
0x11ad   :  { %2384 = vmatprep.mubr.msk.bf16.mxu1 %vm2518_vm1, %v2517_v15  ;;  %2381 = vmatpush3.bf16.msra.mxu1 %v2425_v35 }
0x11ae   :  { %2382 = vmatprep.subr.bf16.mxu1 %v2517_v15 }
0x11b1   :  { %2383 = vmatpush3.bf16.msra.mxu1 %v2426_v36 }
0x11b2   :  { %2388 = vmatprep.subr.bf16.mxu1 %v2517_v15 }
0x126c   :  { %v1694_v52 = vpop.f32.mrf.mxu1 }
0x126d   :  { %v1695_v53 = vadd.f32 %v2114_v31, %v1694_v52 }
0x126e   :  { %v2366_v32 = vpop.f32.mrf.mxu1 }
0x126f   :  { %v1703_v54 = vmul.f32 0.044715, %v1695_v53  ;;  %v1701_v5 = vmul.f32 0.5, %v1695_v53 }
0x1270   :  { %v1697_v55 = vpop.f32.mrf.mxu1 }
0x1271   :  { %v1705_v42 = vmul.f32 %v1703_v54, %v1695_v53  ;;  %v1698_v56 = vadd.f32 %v2114_v31, %v1697_v55  ;;  %v2427_v55 = vld [vmem:[%s3086_s18 + $0x8] sm:$0xff]  }
0x1272   :  { %v2367_v57 = vpop.f32.mrf.mxu1 }
0x1273   :  { %v1707_v58 = vmul.f32 %v1705_v42, %v1695_v53  ;;  %v1704_v59 = vmul.f32 0.044715, %v1698_v56  ;;  %v1702_v6 = vmul.f32 0.5, %v1698_v56  ;;  %v2428_v42 = vld [vmem:[%s3086_s18] sm:$0xff]  }
0x1275   :  { %v1709_v60 = vadd.f32 %v1707_v58, %v1695_v53  ;;  %v1706_v61 = vmul.f32 %v1704_v59, %v1698_v56 }
0x1277   :  { %v1711_v62 = vmul.f32 0.7978846, %v1709_v60  ;;  %v1708_v63 = vmul.f32 %v1706_v61, %v1698_v56 }
0x1279   :  { %2481 = vtanh.f32 %v1711_v62  ;;  %v1710_v0 = vadd.f32 %v1708_v63, %v1698_v56  ;;  %v2137_v56 = vld [vmem:[%s3085_s17] ss:$0 sm:$0xff] }
0x127b   :  { %v1712_v1 = vmul.f32 0.7978846, %v1710_v0 }
0x127d   :  { %2483 = vtanh.f32 %v1712_v1 }
0x1286   :  { %v2482_v2 = vpop.eup %2481 }
0x1287   :  { %v1715_v3 = vadd.f32 1.0, %v2482_v2 }
0x1289   :  { %v1717_v8 = vmul.f32 %v1715_v3, %v1701_v5 }
0x128a   :  { %v2484_v4 = vpop.eup %2483 }
0x128b   :  { %v1716_v7 = vadd.f32 1.0, %v2484_v4 }
0x128d   :  { %v1718_v9 = vmul.f32 %v1716_v7, %v1702_v6 }
0x128f   :  { %v1719_v10 = vpack.c.bf16 %v1718_v9, %v1717_v8 }
0x1291   :  { %2377 = vmatmul.mubr.msk.bf16.vlgmr.msra.gmra.mxu0 %vm899_vm6, %v1719_v10 }
0x1351   :  { %v1798_v12 = vpop.f32.mrf.mxu0 }
0x1352   :  { %v1799_v13 = vadd.f32 %v2127_v11, %v1798_v12  ;;  %v2145_v12 = vld [vmem:[%s3089_s21] ss:$0 sm:$0xff] }
0x1353   :  { %v2378_v14 = vpop.f32.mrf.mxu0 }
0x1354   :  { %v1805_v18 = vadd.f32 %v1799_v13, %v1629_v46 }
0x1355   :  { %v1801_v19 = vpop.f32.mrf.mxu0 }
0x1356   :  { %v1802_v20 = vadd.f32 %v2127_v11, %v1801_v19  ;;  %v1811_v21 = vsel %vm79_vm0, %v1805_v18, 0.0  ;;  %v2007_v11 = vld [vmem:[%s3088_s20] sm:$0x3]  ;;  %s2495_s20 = scalar_lea.vmem %s2036_s24, 32 }
0x1357   :  { %1812 = vadd.xlane.f32.xlu1 %v1811_v21  ;;  %v2379_v22 = vpop.f32.mrf.mxu0  ;;  %v2015_v13 = vmul.f32 %v2145_v12, %v2007_v11  ;;  %p2496_p0 = scmp.ne.s32.totalorder %s2036_s24, %s2495_s20  ;;  %p2501_p2 = scmp.lt.s32.totalorder %s2495_s20, %s2495_s20 }
0x1358   :  { %v1806_v23 = vadd.f32 %v1802_v20, %v1630_v47 }
0x1359   :  { %v2016_v14 = vsel %vm1993_vm8, %v2015_v13, 0.0  ;;  %p2502_p3 = por %p2501_p2, %p2500_p1 }
0x135a   :  { %v1814_v24 = vsel %vm79_vm0, %v1806_v23, 0.0 }
0x135b   :  { %1815 = vadd.xlane.f32.xlu0 %v1814_v24  ;;  %p2503_p4 = pnand %p2502_p3, %p2496_p0 }
0x13e0   :  { %v1813_v16 = vpop.xlane.xlu1 %1812 }
0x13e1   :  { %v1817_v25 = vmul.f32 0.03125, %v1813_v16 }
0x13e3   :  { %v1819_v28 = vsub.f32 %v1805_v18, %v1817_v25 }
0x13e4   :  { %v1816_v17 = vpop.xlane.xlu0 %1815 }
0x13e5   :  { %v1818_v26 = vmul.f32 0.03125, %v1816_v17  ;;  %v1821_v29 = vmul.f32 %v1819_v28, %v1819_v28 }
0x13e7   :  { %v1820_v30 = vsub.f32 %v1806_v23, %v1818_v26  ;;  %v1823_v33 = vsel %vm79_vm0, %v1821_v29, 0.0 }
0x13e8   :  { %1824 = vadd.xlane.f32.xlu1 %v1823_v33 }
0x13e9   :  { %v1822_v34 = vmul.f32 %v1820_v30, %v1820_v30 }
0x13eb   :  { %v1826_v27 = vsel %vm79_vm0, %v1822_v34, 0.0 }
0x13ec   :  { %1827 = vadd.xlane.f32.xlu0 %v1826_v27 }
0x1471   :  { %v1825_v37 = vpop.xlane.xlu1 %1824 }
0x1472   :  { %v1829_v38 = vmul.f32 0.03125, %v1825_v37 }
0x1474   :  { %v1831_v39 = vadd.f32 1e-12, %v1829_v38 }
0x1475   :  { %v1828_v40 = vpop.xlane.xlu0 %1827 }
0x1476   :  { %2485 = vrsqrt.f32 %v1831_v39  ;;  %v1830_v43 = vmul.f32 0.03125, %v1828_v40 }
0x1478   :  { %v1832_v44 = vadd.f32 1e-12, %v1830_v43 }
0x147a   :  { %2487 = vrsqrt.f32 %v1832_v44 }
0x1483   :  { %v2486_v45 = vpop.eup %2485 }
0x1484   :  { %v1835_v46 = vmul.f32 %v2486_v45, %v1819_v28 }
0x1486   :  { %v1843_v50 = vmul.f32 %v2135_v48, %v1835_v46 }
0x1487   :  { %v2488_v47 = vpop.eup %2487 }
0x1488   :  { %v1836_v49 = vmul.f32 %v2488_v47, %v1820_v30  ;;  %v1851_v52 = vadd.f32 %v2136_v41, %v1843_v50 }
0x148a   :  { %v1844_v51 = vmul.f32 %v2135_v48, %v1836_v49 }
0x148c   :  { %v1852_v31 = vadd.f32 %v2136_v41, %v1844_v51 }
0x148e   :  { %v1854_v53 = vrot.slane %v1852_v31, 7 }
0x1490   :  { %v1857_v32 = vsel %vm1856_vm7, %v1851_v52, %v1854_v53 }
0x1491   :  { %v1858_v54 = vpack.c.bf16 %v1857_v32, %v1857_v32 }
0x1493   :  { %2385 = vmatmul.mubr.msk.bf16.vlgmr.msra.gmra.mxu1 %vm79_vm0, %v1858_v54 }
0x1494   :  { %2392 = vmatprep.mubr.msk.bf16.mxu1 %vm2518_vm1, %v2517_v15  ;;  %2389 = vmatpush3.bf16.msra.mxu1 %v2427_v55 }
0x1495   :  { %2390 = vmatprep.subr.bf16.mxu1 %v2517_v15  ;;  %v2141_v15 = vld [vmem:[%s3087_s19] ss:$0 sm:$0xff] }
0x1498   :  { %2391 = vmatpush3.bf16.msra.mxu1 %v2428_v42 }
0x1553   :  { %v1919_v57 = vpop.f32.mrf.mxu1 }
0x1554   :  { %v1920_v58 = vadd.f32 %v2137_v56, %v1919_v57 }
0x1555   :  { %v2386_v59 = vpop.f32.mrf.mxu1 }
0x1556   :  { %2489 = vtanh.f32 %v1920_v58 }
0x1557   :  { %v1922_v60 = vpop.f32.mrf.mxu1 }
0x1559   :  { %v2387_v61 = vpop.f32.mrf.mxu1 }
0x1563   :  { %v2490_v62 = vpop.eup %2489 }
0x1564   :  { %v1926_v63 = vpack.c.bf16 %v2490_v62, %v2490_v62 }
0x1566   :  { %2393 = vmatmul.mubr.msk.bf16.vlgmr.msra.gmra.mxu1 %vm79_vm0, %v1926_v63 }
0x1626   :  { %v1987_v0 = vpop.f32.mrf.mxu1 }
0x1627   :  { %v1988_v1 = vadd.f32 %v2141_v15, %v1987_v0 }
0x1628   :  { %v2394_v2 = vpop.f32.mrf.mxu1 }
0x1629   :  { %v1995_v3 = vsel %vm1993_vm8, %v1988_v1, -inf  ;;  %1994 = vst.msk [vmem:[#allocation3] sm:$0x3] %vm1993_vm8, %v1988_v1 }
0x162a   :  { %1996 = vmax.xlane.f32.xlu0 %v1995_v3  ;;  %v1990_v4 = vpop.f32.mrf.mxu1 }
0x162c   :  { %v2395_v5 = vpop.f32.mrf.mxu1 }
0x162e   :  { %2017 = vadd.xlane.f32.xlu0 %v2016_v14 }
0x16b3   :  { %v1997_v6 = vpop.xlane.xlu0 %1996 }
0x16b4   :  { %v1998_v7 = vsub.f32 %v1988_v1, %v1997_v6 }
0x16b6   :  { %v1999_v8 = vmul.f32 1.442695, %v1998_v7 }
0x16b8   :  { %2491 = vpow2.f32 %v1999_v8 }
0x16c5   :  { %v2492_v9 = vpop.eup %2491 }
0x16c6   :  { %v2001_v10 = vsel %vm1993_vm8, %v2492_v9, 0.0 }
0x16c7   :  { %2002 = vadd.xlane.f32.xlu1 %v2001_v10 }
0x1750   :  { %v2003_v18 = vpop.xlane.xlu1 %2002 }
0x1751   :  { %2493 = vlog2.f32 %v2003_v18 }
0x175e   :  { %v2494_v19 = vpop.eup %2493 }
0x175f   :  { %v2005_v20 = vmul.f32 0.6931472, %v2494_v19 }
0x1761   :  { %v2006_v21 = vsub.f32 %v1998_v7, %v2005_v20 }
0x1763   :  { %v2019_v22 = vmul.f32 %v2007_v11, %v2006_v21 }
0x1765   :  { %v2020_v23 = vsel %vm1993_vm8, %v2019_v22, 0.0 }
0x1766   :  { %2021 = vadd.xlane.f32.xlu1 %v2020_v23 }
0x1767   :  { %2506 = shalt.err (!%p2503_p4)
}
0x1768   :  { %2038 = dma.vmem_to_hbm [thread:$0]  %s2036_s24, 32, %s3090_s22, [#allocation4]   ;;  %v2018_v16 = vpop.xlane.xlu0 %2017  ;;  %vm2025_vm9 = vcmask 7168   ;;  %vm2027_vm10 = vcmask 9216  }
0x17ef   :  { %v2022_v24 = vpop.xlane.xlu1 %2021 }
0x17f0   :  { %v2023_v25 = vsub.f32 0.0, %v2022_v24 }
0x17f2   :  { %v2024_v28 = vmul.f32 %v2023_v25, %v2018_v16 }
0x17f4   :  { %v2026_v17 = vsel %vm2025_vm9, %v2024_v28, %v2018_v16 }
0x17f5   :  { %2028 = vst.msk [vmem:[%s3091_s23] sm:$0x3] %vm2027_vm10, %v2026_v17 }
0x17f6   :  { %2515 = dma.done.wait [#allocation4], 32  }
0x17f7   :  { %2516 = vsyncadd [#allocation4], 4294967264 }
0x17f8   :  { %2046 = vsyncpa [#allocation4], 1 }

</bundles_post_ra>
